<compile_context>
chip_gen: v6e
topology: v6e:2x2x1
jax: 0.10.0
libtpu: 0.0.40
codegen_flags: <defaults>
</compile_context>

<pallas_src>
import functools

import jax
import jax.numpy as jnp
from jax.experimental import pallas as pl
from jax.experimental.pallas import tpu as pltpu


def _ttt_process_input_kernel(
    H, hd, HD,
    x_ref, wf_ref, bf_ref,
    cos_ref, sino_ref, sine_ref,
    red_ref, exp_ref, rep_ref,
    ttt_w_ref, ttt_b_ref,
    xq_out, xk_out, xv_out, lr_out):
  """Processes one (batch, seq-tile) block.

  x_ref     : (1, Lt, W)       hidden-state tile
  wf_ref    : (W, 3*HD+LRP)    fused [wq | wk | wv | lr_gate] weight (compute dtype)
  bf_ref    : (1, 3*HD+LRP)    fused bias (f32)
  cos_ref   : (Lt, hd)         rope cos per head-dim lane (1 on text rows)
  sino_ref  : (Lt, hd)         rope sin masked to odd lanes (0 on text rows)
  sine_ref  : (Lt, hd)         rope sin masked to even lanes
  red_ref   : (HD, H)          per-head reduce matrix (block column of ones)
  exp_ref   : (H, HD)          per-head expand matrix (= red.T)
  rep_ref   : (hd, HD)         head-replication matrix for the rope tables
  ttt_w_ref : (1, HD)          ttt layer-norm weight (head-flattened)
  ttt_b_ref : (1, HD)          ttt layer-norm bias
  """
  xb = x_ref[0].astype(wf_ref.dtype)                       # (Lt, W)

  # one fused MXU pass over x: [xq | xk | xv | lr_logits]
  proj = jnp.dot(xb, wf_ref[...], preferred_element_type=jnp.float32)
  proj = proj + bf_ref[...]

  red = red_ref[...]
  expm = exp_ref[...]
  rep = rep_ref[...]

  # rope tables replicated across heads once (shared by Q and K)
  cos = jnp.dot(cos_ref[...], rep, preferred_element_type=jnp.float32)    # (Lt, HD)
  sin_o = jnp.dot(sino_ref[...], rep, preferred_element_type=jnp.float32)
  sin_e = jnp.dot(sine_ref[...], rep, preferred_element_type=jnp.float32)

  def expand_heads(s):        # (Lt, H) -> (Lt, HD)
    return jnp.dot(s, expm, preferred_element_type=jnp.float32)

  def l2_normalize(v):        # per-head F.normalize(p=2, dim=-1), eps = 1e-12
    ss = jnp.dot(v * v, red, preferred_element_type=jnp.float32)          # (Lt, H)
    inv = jax.lax.rsqrt(jnp.maximum(ss, 1e-24))   # == 1 / max(||v||, 1e-12)
    return v * expand_heads(inv)

  def rope(v):
    # interleaved-pair rotation via XLU lane rolls (no HDxHD matmul):
    #   out[2i]   = v[2i]*c_i - v[2i+1]*s_i
    #   out[2i+1] = v[2i]*s_i + v[2i+1]*c_i
    # (lane wrap at positions 0 / HD-1 is multiplied by a zero sin mask)
    return (v * cos
            + pltpu.roll(v, 1, axis=1) * sin_o
            - pltpu.roll(v, HD - 1, axis=1) * sin_e)

  def store_heads(out_ref, v):      # (Lt, HD) -> (1, H, Lt, hd) head-major output
    for h in range(H):
      out_ref[0, h] = v[:, h * hd:(h + 1) * hd].astype(out_ref.dtype)

  # --- Q path (project -> normalize -> rope -> store) ---
  xq_r = rope(l2_normalize(proj[:, 0:HD]))
  store_heads(xq_out, xq_r)

  # --- K path (kept live for the reconstruction target) ---
  xk_r = rope(l2_normalize(proj[:, HD:2 * HD]))
  store_heads(xk_out, xk_r)

  # --- V path: ln_reconstruction_target (per-head mean / unbiased std) ---
  d = proj[:, 2 * HD:3 * HD] - xk_r
  mean_h = jnp.dot(d, red, preferred_element_type=jnp.float32) * (1.0 / hd)        # (Lt, H)
  dc = d - expand_heads(mean_h)
  var_h = jnp.dot(dc * dc, red, preferred_element_type=jnp.float32) * (1.0 / (hd - 1))
  inv_std_h = 1.0 / (jnp.sqrt(var_h) + 1e-8)                # divides on a tiny (Lt,H) array
  dn = dc * expand_heads(inv_std_h)
  xv_t = ttt_w_ref[...] * dn + ttt_b_ref[...] + xk_r
  store_heads(xv_out, xv_t)

  # --- ttt learning-rate gate (lane-dense 128-padded slab) ---
  lr_out[0] = jax.nn.sigmoid(proj[:, 3 * HD:]).astype(lr_out.dtype)


def ttt_process_input(hidden_states, freqs_cos, freqs_sin, params, *,
                      num_heads, head_dim, mini_batch_size, seq_text_length,
                      ttt_base_lr, l_tile=None, compute_dtype=jnp.bfloat16):
  B, L, W = hidden_states.shape
  H, hd = num_heads, head_dim
  HD = H * hd
  C = mini_batch_size
  assert L % C == 0
  NC = L // C
  assert hd % 2 == 0 and hd >= 2

  # Sequence tile.  Production sizing (review): pick the largest multiple of 8
  # that keeps (~5 live (L_TILE,HD) f32 slabs + single-buffered weights) inside
  # the generation's VMEM budget (64 MiB on v7x, 128 MiB on v5e/v6e).
  if l_tile is None:
    l_tile = L
    for cand in (512, 256, 128, 64, 32, 16, 8):
      if L % cand == 0:
        l_tile = cand
        break
  assert L % l_tile == 0 and l_tile % 8 == 0
  S = L // l_tile

  LRP = ((H + 127) // 128) * 128            # lr-gate lanes padded to 128 (lane-dense stores)
  NF = 3 * HD + LRP

  # ---- rope tables over the full sequence, per head-dim lane (NOT per head) ----
  st = seq_text_length
  video_len = L - st
  if freqs_cos.shape[0] < video_len:
    pad = video_len - freqs_cos.shape[0]
    # faithful to torch: freqs_cis padded with complex zeros -> cos = sin = 0
    freqs_cos = jnp.concatenate(
        [freqs_cos, jnp.zeros((pad, freqs_cos.shape[1]), freqs_cos.dtype)], 0)
    freqs_sin = jnp.concatenate(
        [freqs_sin, jnp.zeros((pad, freqs_sin.shape[1]), freqs_sin.dtype)], 0)
  cos_vid = jnp.repeat(freqs_cos[:video_len].astype(jnp.float32), 2, axis=-1)   # (video_len, hd)
  sin_vid = jnp.repeat(freqs_sin[:video_len].astype(jnp.float32), 2, axis=-1)
  cos_all = jnp.concatenate([jnp.ones((st, hd), jnp.float32), cos_vid], 0)      # (L, hd)
  sin_all = jnp.concatenate([jnp.zeros((st, hd), jnp.float32), sin_vid], 0)
  parity = (jnp.arange(hd) % 2).astype(jnp.float32)                              # 1 on odd lanes
  sin_odd = sin_all * parity
  sin_even = sin_all * (1.0 - parity)

  # ---- small structural constants (exact 0/1 matrices) ----
  red = jnp.kron(jnp.eye(H, dtype=jnp.float32), jnp.ones((hd, 1), jnp.float32))   # (HD, H)
  expd = red.T                                                                    # (H, HD)
  rep = jnp.kron(jnp.ones((1, H), jnp.float32), jnp.eye(hd, dtype=jnp.float32))   # (hd, HD)

  # ---- fused projection [wq | wk | wv | lr_gate] ----
  lrw_t = params['lr_weight'].T.astype(jnp.float32)                               # (W, H)
  lrw_pad = jnp.zeros((W, LRP), jnp.float32).at[:, :H].set(lrw_t)
  w_fused = jnp.concatenate(
      [params['wq'], params['wk'], params['wv'], lrw_pad], axis=1).astype(compute_dtype)
  lrb_pad = jnp.zeros((LRP,), jnp.float32).at[:H].set(params['lr_bias'])
  b_fused = jnp.concatenate(
      [params['bq'], params['bk'], params['bv'], lrb_pad]).astype(jnp.float32).reshape(1, NF)

  ttt_w = params['ttt_norm_weight'].reshape(1, HD).astype(jnp.float32)
  ttt_b = params['ttt_norm_bias'].reshape(1, HD).astype(jnp.float32)

  out_dtype = hidden_states.dtype

  # TODO(synk): on v7x, mark the constant blocks below pipeline_mode=pl.Buffered(1)
  # (single-buffered) and set vmem_limit_bytes explicitly per generation.
  const2 = lambda shape: pl.BlockSpec(shape, lambda b, s: (0, 0))

  grid_spec = pltpu.PrefetchScalarGridSpec(
      num_scalar_prefetch=0,
      grid=(B, S),
      in_specs=[
          pl.BlockSpec((1, l_tile, W), lambda b, s: (b, s, 0)),     # x tile
          const2((W, NF)), const2((1, NF)),                          # fused weight / bias
          pl.BlockSpec((l_tile, hd), lambda b, s: (s, 0)),           # cos
          pl.BlockSpec((l_tile, hd), lambda b, s: (s, 0)),           # sin (odd lanes)
          pl.BlockSpec((l_tile, hd), lambda b, s: (s, 0)),           # sin (even lanes)
          const2((HD, H)), const2((H, HD)), const2((hd, HD)),        # reduce / expand / replicate
          const2((1, HD)), const2((1, HD)),                          # ttt ln weight / bias
      ],
      out_specs=[
          pl.BlockSpec((1, H, l_tile, hd), lambda b, s: (b, 0, s, 0)),
          pl.BlockSpec((1, H, l_tile, hd), lambda b, s: (b, 0, s, 0)),
          pl.BlockSpec((1, H, l_tile, hd), lambda b, s: (b, 0, s, 0)),
          pl.BlockSpec((1, l_tile, LRP), lambda b, s: (b, s, 0)),
      ],
  )
  out_shapes = (
      jax.ShapeDtypeStruct((B, H, L, hd), out_dtype),
      jax.ShapeDtypeStruct((B, H, L, hd), out_dtype),
      jax.ShapeDtypeStruct((B, H, L, hd), out_dtype),
      jax.ShapeDtypeStruct((B, L, LRP), jnp.float32),
  )

  xq, xk, xv, lr_pad = pl.pallas_call(
      functools.partial(_ttt_process_input_kernel, H, hd, HD),
      out_shape=out_shapes,
      grid_spec=grid_spec,
      compiler_params=pltpu.CompilerParams(
          dimension_semantics=("parallel", "parallel")),
  )(hidden_states, w_fused, b_fused, cos_all, sin_odd, sin_even,
    red, expd, rep, ttt_w, ttt_b)

  # outputs are already head-major: (B, H, L, hd) -> (B, H, NC, C, hd) is a free reshape
  XQ = xq.reshape(B, H, NC, C, hd)
  XK = xk.reshape(B, H, NC, C, hd)
  XV = xv.reshape(B, H, NC, C, hd)

  lr = lr_pad[:, :, :H]                                      # (B, L, H)
  ttt_lr = lr.transpose(0, 2, 1).reshape(B, H, NC, 1, C)
  eta_mb = (ttt_base_lr / hd / C) * ttt_lr                   # (B, H, NC, 1, C)
  # TODO(synk): the original module repeats eta to (B,H,NC,C,C); that repeat is
  # pure replication and is deferred to the downstream TTT inner-loop consumer
  # (see expand_eta) instead of being materialized in HBM.
  return XQ, XK, XV, eta_mb


def expand_eta(eta_mb, mini_batch_size):
  """Recovers the original module's (B, H, NC, C, C) eta (pure replication)."""
  B, H, NC, _, C = eta_mb.shape
  return jnp.broadcast_to(eta_mb, (B, H, NC, mini_batch_size, C))


def reference_process_input(hidden_states, freqs_cos, freqs_sin, params, *,
                            num_heads, head_dim, mini_batch_size,
                            seq_text_length, ttt_base_lr):
  """Plain-JAX mirror of the PyTorch process_input, for verification."""
  B, L, W = hidden_states.shape
  H, hd = num_heads, head_dim
  xq = hidden_states @ params['wq'] + params['bq']
  xk = hidden_states @ params['wk'] + params['bk']
  xv = hidden_states @ params['wv'] + params['bv']
  xq = xq.reshape(B, L, H, hd)
  xk = xk.reshape(B, L, H, hd)
  xv = xv.reshape(B, L, H, hd)

  def l2n(v):
    n = jnp.sqrt(jnp.sum(v * v, -1, keepdims=True))
    return v / jnp.maximum(n, 1e-12)

  xq, xk = l2n(xq), l2n(xk)
  st = seq_text_length
  video_len = L - st
  fc, fs = freqs_cos, freqs_sin
  if fc.shape[0] < video_len:
    pad = video_len - fc.shape[0]
    fc = jnp.concatenate([fc, jnp.zeros((pad, fc.shape[1]), fc.dtype)], 0)
    fs = jnp.concatenate([fs, jnp.zeros((pad, fs.shape[1]), fs.dtype)], 0)

  def rope(v):
    vt, vv = v[:, :st], v[:, st:]
    ve, vo = vv[..., 0::2], vv[..., 1::2]
    c = fc[None, :, None, :]
    s = fs[None, :, None, :]
    oe = ve * c - vo * s
    oo = ve * s + vo * c
    vr = jnp.stack([oe, oo], axis=-1).reshape(vv.shape)
    return jnp.concatenate([vt, vr], axis=1)

  xq, xk = rope(xq), rope(xk)
  d = xv - xk
  mean = d.mean(-1, keepdims=True)
  std = jnp.sqrt(jnp.sum((d - mean) ** 2, -1, keepdims=True) / (hd - 1))
  dn = (d - mean) / (std + 1e-8)
  xv = params['ttt_norm_weight'][None, None] * dn + params['ttt_norm_bias'][None, None] + xk

  NC, C = L // mini_batch_size, mini_batch_size
  mb = lambda v: v.transpose(0, 2, 1, 3).reshape(B, H, NC, C, hd)
  XQ, XK, XV = mb(xq), mb(xk), mb(xv)
  lr = jax.nn.sigmoid(hidden_states @ params['lr_weight'].T + params['lr_bias'][None, None, :])
  ttt_lr = (ttt_base_lr / hd) * lr.transpose(0, 2, 1).reshape(B, H, NC, 1, C)
  eta = (1.0 / C) * jnp.broadcast_to(ttt_lr, (B, H, NC, C, C))
  return XQ, XK, XV, eta


if __name__ == "__main__":
  # small config consistent with TTTBase.__init__ (model_dim = num_heads * head_dim)
  B, L = 2, 16
  H, hd = 4, 32
  W = H * hd                 # model_dim = 128 (keeps lane dims 128-aligned)
  C = 8                      # mini_batch_size
  seq_text_length = 8
  ttt_base_lr = 1.0
  HD = H * hd

  key = jax.random.PRNGKey(0)
  ks = jax.random.split(key, 10)
  hidden_states = jax.random.normal(ks[0], (B, L, W), jnp.float32)

  params = dict(
      # stored pre-transposed: (W, H*hd), matching Linear.weight.T
      wq=0.02 * jax.random.normal(ks[1], (W, HD), jnp.float32),
      wk=0.02 * jax.random.normal(ks[2], (W, HD), jnp.float32),
      wv=0.02 * jax.random.normal(ks[3], (W, HD), jnp.float32),
      bq=0.02 * jax.random.normal(ks[4], (HD,), jnp.float32),
      bk=0.02 * jax.random.normal(ks[5], (HD,), jnp.float32),
      bv=0.02 * jax.random.normal(ks[6], (HD,), jnp.float32),
      ttt_norm_weight=jnp.ones((H, hd), jnp.float32),
      ttt_norm_bias=jnp.zeros((H, hd), jnp.float32),
      lr_weight=0.02 * jax.random.normal(ks[7], (H, W), jnp.float32),  # (H,1,W) squeezed
      lr_bias=jnp.zeros((H,), jnp.float32),
      # wo / post_norm exist in __init__ but are unused by process_input
      wo=0.02 * jax.random.normal(ks[8], (W, HD), jnp.float32),
      bo=jnp.zeros((HD,), jnp.float32),
      post_norm_weight=jnp.ones((W,), jnp.float32),
      post_norm_bias=jnp.zeros((W,), jnp.float32),
  )

  # rotary frequency table (cos/sin halves of the complex freqs_cis)
  video_len = L - seq_text_length
  pos = jnp.arange(video_len, dtype=jnp.float32)[:, None]
  inv_freq = 1.0 / (10000.0 ** (jnp.arange(0, hd, 2, dtype=jnp.float32) / hd))
  angles = pos * inv_freq[None, :]
  freqs_cos = jnp.cos(angles)
  freqs_sin = jnp.sin(angles)

  kwargs = dict(num_heads=H, head_dim=hd, mini_batch_size=C,
                seq_text_length=seq_text_length, ttt_base_lr=ttt_base_lr)

  rXQ, rXK, rXV, reta = reference_process_input(
      hidden_states, freqs_cos, freqs_sin, params, **kwargs)

  # ---- fp32 compute path: strict check ----
  XQ, XK, XV, eta_mb = ttt_process_input(
      hidden_states, freqs_cos, freqs_sin, params,
      l_tile=8, compute_dtype=jnp.float32, **kwargs)
  jax.block_until_ready((XQ, XK, XV, eta_mb))
  eta = expand_eta(eta_mb, C)
  for got, want, tol in ((XQ, rXQ, 1e-4), (XK, rXK, 1e-4),
                         (XV, rXV, 1e-4), (eta, reta, 1e-5)):
    assert got.shape == want.shape, (got.shape, want.shape)
    g = got.astype(jnp.float32)
    assert jnp.allclose(g, want, atol=tol, rtol=tol), float(jnp.max(jnp.abs(g - want)))

  # ---- bf16 compute path (production default): loose check ----
  XQb, XKb, XVb, eta_mbb = ttt_process_input(
      hidden_states, freqs_cos, freqs_sin, params,
      l_tile=8, compute_dtype=jnp.bfloat16, **kwargs)
  jax.block_until_ready((XQb, XKb, XVb, eta_mbb))
  etab = expand_eta(eta_mbb, C)
  for got, want in ((XQb, rXQ), (XKb, rXK), (XVb, rXV), (etab, reta)):
    assert got.shape == want.shape, (got.shape, want.shape)
    g = got.astype(jnp.float32)
    assert jnp.allclose(g, want, atol=5e-2, rtol=5e-2), float(jnp.max(jnp.abs(g - want)))

  print("KERNEL_OK")
</pallas_src>

<mosaic_0001>
module attributes {stable_mosaic.version = 11 : i64} {
  func.func @_ttt_process_input_kernel(%arg0: i32, %arg1: i32, %arg2: memref<1x8x128xf32, #tpu.memory_space<vmem>>, %arg3: memref<128x512xf32, #tpu.memory_space<vmem>>, %arg4: memref<1x512xf32, #tpu.memory_space<vmem>>, %arg5: memref<8x32xf32, #tpu.memory_space<vmem>>, %arg6: memref<8x32xf32, #tpu.memory_space<vmem>>, %arg7: memref<8x32xf32, #tpu.memory_space<vmem>>, %arg8: memref<128x4xf32, #tpu.memory_space<vmem>>, %arg9: memref<4x128xf32, #tpu.memory_space<vmem>>, %arg10: memref<32x128xf32, #tpu.memory_space<vmem>>, %arg11: memref<1x128xf32, #tpu.memory_space<vmem>>, %arg12: memref<1x128xf32, #tpu.memory_space<vmem>>, %arg13: memref<1x4x8x32xf32, #tpu.memory_space<vmem>>, %arg14: memref<1x4x8x32xf32, #tpu.memory_space<vmem>>, %arg15: memref<1x4x8x32xf32, #tpu.memory_space<vmem>>, %arg16: memref<1x8x128xf32, #tpu.memory_space<vmem>>) attributes {dimension_semantics = [#tpu.dimension_semantics<parallel>, #tpu.dimension_semantics<parallel>], iteration_bounds = array<i64: 2, 2>, scalar_prefetch = 0 : i64, scratch_operands = 0 : i64, tpu.core_type = #tpu.core_type<tc>, window_params = [{transform_indices = @transform_0, window_bounds = array<i64: 1, 8, 128>}, {pipeline_mode = #tpu.pipeline_mode<synchronous>, transform_indices = @transform_1, window_bounds = array<i64: 128, 512>}, {pipeline_mode = #tpu.pipeline_mode<synchronous>, transform_indices = @transform_2, window_bounds = array<i64: 1, 512>}, {transform_indices = @transform_3, window_bounds = array<i64: 8, 32>}, {transform_indices = @transform_4, window_bounds = array<i64: 8, 32>}, {transform_indices = @transform_5, window_bounds = array<i64: 8, 32>}, {pipeline_mode = #tpu.pipeline_mode<synchronous>, transform_indices = @transform_6, window_bounds = array<i64: 128, 4>}, {pipeline_mode = #tpu.pipeline_mode<synchronous>, transform_indices = @transform_7, window_bounds = array<i64: 4, 128>}, {pipeline_mode = #tpu.pipeline_mode<synchronous>, transform_indices = @transform_8, window_bounds = array<i64: 32, 128>}, {pipeline_mode = #tpu.pipeline_mode<synchronous>, transform_indices = @transform_9, window_bounds = array<i64: 1, 128>}, {pipeline_mode = #tpu.pipeline_mode<synchronous>, transform_indices = @transform_10, window_bounds = array<i64: 1, 128>}, {transform_indices = @transform_11, window_bounds = array<i64: 1, 4, 8, 32>}, {transform_indices = @transform_12, window_bounds = array<i64: 1, 4, 8, 32>}, {transform_indices = @transform_13, window_bounds = array<i64: 1, 4, 8, 32>}, {transform_indices = @transform_14, window_bounds = array<i64: 1, 8, 128>}]} {
    %c0 = arith.constant 0 : index
    %c0_0 = arith.constant 0 : index
    %c0_1 = arith.constant 0 : index
    %0 = vector.load %arg2[%c0, %c0_0, %c0_1] : memref<1x8x128xf32, #tpu.memory_space<vmem>>, vector<1x8x128xf32>
    %1 = vector.shape_cast %0 : vector<1x8x128xf32> to vector<8x128xf32>
    %c0_2 = arith.constant 0 : index
    %c0_3 = arith.constant 0 : index
    %2 = vector.load %arg3[%c0_2, %c0_3] : memref<128x512xf32, #tpu.memory_space<vmem>>, vector<128x512xf32>
    %cst = arith.constant dense<0.000000e+00> : vector<8x512xf32>
    %3 = tpu.matmul %1, %2, %cst {dimension_numbers = #tpu.dot_dimension_numbers<[1], [0], [0], [1], [0, 0, 1, 1], [], []>} : vector<8x128xf32>, vector<128x512xf32>, vector<8x512xf32> -> vector<8x512xf32>
    %c0_4 = arith.constant 0 : index
    %c0_5 = arith.constant 0 : index
    %4 = vector.load %arg4[%c0_4, %c0_5] : memref<1x512xf32, #tpu.memory_space<vmem>>, vector<1x512xf32>
    %5 = vector.broadcast %4 : vector<1x512xf32> to vector<8x512xf32>
    %6 = arith.addf %3, %5 : vector<8x512xf32>
    %c0_6 = arith.constant 0 : index
    %c0_7 = arith.constant 0 : index
    %7 = vector.load %arg8[%c0_6, %c0_7] : memref<128x4xf32, #tpu.memory_space<vmem>>, vector<128x4xf32>
    %c0_8 = arith.constant 0 : index
    %c0_9 = arith.constant 0 : index
    %8 = vector.load %arg9[%c0_8, %c0_9] : memref<4x128xf32, #tpu.memory_space<vmem>>, vector<4x128xf32>
    %c0_10 = arith.constant 0 : index
    %c0_11 = arith.constant 0 : index
    %9 = vector.load %arg10[%c0_10, %c0_11] : memref<32x128xf32, #tpu.memory_space<vmem>>, vector<32x128xf32>
    %c0_12 = arith.constant 0 : index
    %c0_13 = arith.constant 0 : index
    %10 = vector.load %arg5[%c0_12, %c0_13] : memref<8x32xf32, #tpu.memory_space<vmem>>, vector<8x32xf32>
    %cst_14 = arith.constant dense<0.000000e+00> : vector<8x128xf32>
    %11 = tpu.matmul %10, %9, %cst_14 {dimension_numbers = #tpu.dot_dimension_numbers<[1], [0], [0], [1], [0, 0, 1, 1], [], []>} : vector<8x32xf32>, vector<32x128xf32>, vector<8x128xf32> -> vector<8x128xf32>
    %c0_15 = arith.constant 0 : index
    %c0_16 = arith.constant 0 : index
    %12 = vector.load %arg6[%c0_15, %c0_16] : memref<8x32xf32, #tpu.memory_space<vmem>>, vector<8x32xf32>
    %cst_17 = arith.constant dense<0.000000e+00> : vector<8x128xf32>
    %13 = tpu.matmul %12, %9, %cst_17 {dimension_numbers = #tpu.dot_dimension_numbers<[1], [0], [0], [1], [0, 0, 1, 1], [], []>} : vector<8x32xf32>, vector<32x128xf32>, vector<8x128xf32> -> vector<8x128xf32>
    %c0_18 = arith.constant 0 : index
    %c0_19 = arith.constant 0 : index
    %14 = vector.load %arg7[%c0_18, %c0_19] : memref<8x32xf32, #tpu.memory_space<vmem>>, vector<8x32xf32>
    %cst_20 = arith.constant dense<0.000000e+00> : vector<8x128xf32>
    %15 = tpu.matmul %14, %9, %cst_20 {dimension_numbers = #tpu.dot_dimension_numbers<[1], [0], [0], [1], [0, 0, 1, 1], [], []>} : vector<8x32xf32>, vector<32x128xf32>, vector<8x128xf32> -> vector<8x128xf32>
    %16 = vector.extract_strided_slice %6 {offsets = [0, 0], sizes = [8, 128], strides = [1, 1]} : vector<8x512xf32> to vector<8x128xf32>
    %17 = arith.mulf %16, %16 : vector<8x128xf32>
    %cst_21 = arith.constant dense<0.000000e+00> : vector<8x4xf32>
    %18 = tpu.matmul %17, %7, %cst_21 {dimension_numbers = #tpu.dot_dimension_numbers<[1], [0], [0], [1], [0, 0, 1, 1], [], []>} : vector<8x128xf32>, vector<128x4xf32>, vector<8x4xf32> -> vector<8x4xf32>
    %cst_22 = arith.constant 1.000000e-24 : f32
    %19 = vector.broadcast %cst_22 : f32 to vector<8x4xf32>
    %20 = arith.maximumf %18, %19 : vector<8x4xf32>
    %21 = math.rsqrt %20 : vector<8x4xf32>
    %cst_23 = arith.constant dense<0.000000e+00> : vector<8x128xf32>
    %22 = tpu.matmul %21, %8, %cst_23 {dimension_numbers = #tpu.dot_dimension_numbers<[1], [0], [0], [1], [0, 0, 1, 1], [], []>} : vector<8x4xf32>, vector<4x128xf32>, vector<8x128xf32> -> vector<8x128xf32>
    %23 = arith.mulf %16, %22 : vector<8x128xf32>
    %24 = arith.mulf %23, %11 : vector<8x128xf32>
    %c1_i32 = arith.constant 1 : i32
    %25 = tpu.dynamic_rotate %23 by %c1_i32 dim 1 : vector<8x128xf32>, i32 -> vector<8x128xf32>
    %26 = arith.mulf %25, %13 : vector<8x128xf32>
    %27 = arith.addf %24, %26 : vector<8x128xf32>
    %c127_i32 = arith.constant 127 : i32
    %28 = tpu.dynamic_rotate %23 by %c127_i32 dim 1 : vector<8x128xf32>, i32 -> vector<8x128xf32>
    %29 = arith.mulf %28, %15 : vector<8x128xf32>
    %30 = arith.subf %27, %29 : vector<8x128xf32>
    %31 = vector.extract_strided_slice %30 {offsets = [0, 0], sizes = [8, 32], strides = [1, 1]} : vector<8x128xf32> to vector<8x32xf32>
    %c0_24 = arith.constant 0 : index
    %c0_25 = arith.constant 0 : index
    %c0_26 = arith.constant 0 : index
    %c0_27 = arith.constant 0 : index
    %32 = vector.load %arg13[%c0_24, %c0_25, %c0_26, %c0_27] : memref<1x4x8x32xf32, #tpu.memory_space<vmem>>, vector<1x1x8x32xf32>
    %33 = vector.shape_cast %32 : vector<1x1x8x32xf32> to vector<8x32xf32>
    %34 = vector.shape_cast %31 : vector<8x32xf32> to vector<1x1x8x32xf32>
    tpu.vector_store %arg13[%c0_24, %c0_25, %c0_26, %c0_27], %34 {strides = array<i32>} : memref<1x4x8x32xf32, #tpu.memory_space<vmem>>, vector<1x1x8x32xf32>,
    %35 = vector.extract_strided_slice %30 {offsets = [0, 32], sizes = [8, 32], strides = [1, 1]} : vector<8x128xf32> to vector<8x32xf32>
    %c0_28 = arith.constant 0 : index
    %c1 = arith.constant 1 : index
    %c0_29 = arith.constant 0 : index
    %c0_30 = arith.constant 0 : index
    %36 = vector.load %arg13[%c0_28, %c1, %c0_29, %c0_30] : memref<1x4x8x32xf32, #tpu.memory_space<vmem>>, vector<1x1x8x32xf32>
    %37 = vector.shape_cast %36 : vector<1x1x8x32xf32> to vector<8x32xf32>
    %38 = vector.shape_cast %35 : vector<8x32xf32> to vector<1x1x8x32xf32>
    tpu.vector_store %arg13[%c0_28, %c1, %c0_29, %c0_30], %38 {strides = array<i32>} : memref<1x4x8x32xf32, #tpu.memory_space<vmem>>, vector<1x1x8x32xf32>,
    %39 = vector.extract_strided_slice %30 {offsets = [0, 64], sizes = [8, 32], strides = [1, 1]} : vector<8x128xf32> to vector<8x32xf32>
    %c0_31 = arith.constant 0 : index
    %c2 = arith.constant 2 : index
    %c0_32 = arith.constant 0 : index
    %c0_33 = arith.constant 0 : index
    %40 = vector.load %arg13[%c0_31, %c2, %c0_32, %c0_33] : memref<1x4x8x32xf32, #tpu.memory_space<vmem>>, vector<1x1x8x32xf32>
    %41 = vector.shape_cast %40 : vector<1x1x8x32xf32> to vector<8x32xf32>
    %42 = vector.shape_cast %39 : vector<8x32xf32> to vector<1x1x8x32xf32>
    tpu.vector_store %arg13[%c0_31, %c2, %c0_32, %c0_33], %42 {strides = array<i32>} : memref<1x4x8x32xf32, #tpu.memory_space<vmem>>, vector<1x1x8x32xf32>,
    %43 = vector.extract_strided_slice %30 {offsets = [0, 96], sizes = [8, 32], strides = [1, 1]} : vector<8x128xf32> to vector<8x32xf32>
    %c0_34 = arith.constant 0 : index
    %c3 = arith.constant 3 : index
    %c0_35 = arith.constant 0 : index
    %c0_36 = arith.constant 0 : index
    %44 = vector.load %arg13[%c0_34, %c3, %c0_35, %c0_36] : memref<1x4x8x32xf32, #tpu.memory_space<vmem>>, vector<1x1x8x32xf32>
    %45 = vector.shape_cast %44 : vector<1x1x8x32xf32> to vector<8x32xf32>
    %46 = vector.shape_cast %43 : vector<8x32xf32> to vector<1x1x8x32xf32>
    tpu.vector_store %arg13[%c0_34, %c3, %c0_35, %c0_36], %46 {strides = array<i32>} : memref<1x4x8x32xf32, #tpu.memory_space<vmem>>, vector<1x1x8x32xf32>,
    %47 = vector.extract_strided_slice %6 {offsets = [0, 128], sizes = [8, 128], strides = [1, 1]} : vector<8x512xf32> to vector<8x128xf32>
    %48 = arith.mulf %47, %47 : vector<8x128xf32>
    %cst_37 = arith.constant dense<0.000000e+00> : vector<8x4xf32>
    %49 = tpu.matmul %48, %7, %cst_37 {dimension_numbers = #tpu.dot_dimension_numbers<[1], [0], [0], [1], [0, 0, 1, 1], [], []>} : vector<8x128xf32>, vector<128x4xf32>, vector<8x4xf32> -> vector<8x4xf32>
    %cst_38 = arith.constant 1.000000e-24 : f32
    %50 = vector.broadcast %cst_38 : f32 to vector<8x4xf32>
    %51 = arith.maximumf %49, %50 : vector<8x4xf32>
    %52 = math.rsqrt %51 : vector<8x4xf32>
    %cst_39 = arith.constant dense<0.000000e+00> : vector<8x128xf32>
    %53 = tpu.matmul %52, %8, %cst_39 {dimension_numbers = #tpu.dot_dimension_numbers<[1], [0], [0], [1], [0, 0, 1, 1], [], []>} : vector<8x4xf32>, vector<4x128xf32>, vector<8x128xf32> -> vector<8x128xf32>
    %54 = arith.mulf %47, %53 : vector<8x128xf32>
    %55 = arith.mulf %54, %11 : vector<8x128xf32>
    %c1_i32_40 = arith.constant 1 : i32
    %56 = tpu.dynamic_rotate %54 by %c1_i32_40 dim 1 : vector<8x128xf32>, i32 -> vector<8x128xf32>
    %57 = arith.mulf %56, %13 : vector<8x128xf32>
    %58 = arith.addf %55, %57 : vector<8x128xf32>
    %c127_i32_41 = arith.constant 127 : i32
    %59 = tpu.dynamic_rotate %54 by %c127_i32_41 dim 1 : vector<8x128xf32>, i32 -> vector<8x128xf32>
    %60 = arith.mulf %59, %15 : vector<8x128xf32>
    %61 = arith.subf %58, %60 : vector<8x128xf32>
    %62 = vector.extract_strided_slice %61 {offsets = [0, 0], sizes = [8, 32], strides = [1, 1]} : vector<8x128xf32> to vector<8x32xf32>
    %c0_42 = arith.constant 0 : index
    %c0_43 = arith.constant 0 : index
    %c0_44 = arith.constant 0 : index
    %c0_45 = arith.constant 0 : index
    %63 = vector.load %arg14[%c0_42, %c0_43, %c0_44, %c0_45] : memref<1x4x8x32xf32, #tpu.memory_space<vmem>>, vector<1x1x8x32xf32>
    %64 = vector.shape_cast %63 : vector<1x1x8x32xf32> to vector<8x32xf32>
    %65 = vector.shape_cast %62 : vector<8x32xf32> to vector<1x1x8x32xf32>
    tpu.vector_store %arg14[%c0_42, %c0_43, %c0_44, %c0_45], %65 {strides = array<i32>} : memref<1x4x8x32xf32, #tpu.memory_space<vmem>>, vector<1x1x8x32xf32>,
    %66 = vector.extract_strided_slice %61 {offsets = [0, 32], sizes = [8, 32], strides = [1, 1]} : vector<8x128xf32> to vector<8x32xf32>
    %c0_46 = arith.constant 0 : index
    %c1_47 = arith.constant 1 : index
    %c0_48 = arith.constant 0 : index
    %c0_49 = arith.constant 0 : index
    %67 = vector.load %arg14[%c0_46, %c1_47, %c0_48, %c0_49] : memref<1x4x8x32xf32, #tpu.memory_space<vmem>>, vector<1x1x8x32xf32>
    %68 = vector.shape_cast %67 : vector<1x1x8x32xf32> to vector<8x32xf32>
    %69 = vector.shape_cast %66 : vector<8x32xf32> to vector<1x1x8x32xf32>
    tpu.vector_store %arg14[%c0_46, %c1_47, %c0_48, %c0_49], %69 {strides = array<i32>} : memref<1x4x8x32xf32, #tpu.memory_space<vmem>>, vector<1x1x8x32xf32>,
    %70 = vector.extract_strided_slice %61 {offsets = [0, 64], sizes = [8, 32], strides = [1, 1]} : vector<8x128xf32> to vector<8x32xf32>
    %c0_50 = arith.constant 0 : index
    %c2_51 = arith.constant 2 : index
    %c0_52 = arith.constant 0 : index
    %c0_53 = arith.constant 0 : index
    %71 = vector.load %arg14[%c0_50, %c2_51, %c0_52, %c0_53] : memref<1x4x8x32xf32, #tpu.memory_space<vmem>>, vector<1x1x8x32xf32>
    %72 = vector.shape_cast %71 : vector<1x1x8x32xf32> to vector<8x32xf32>
    %73 = vector.shape_cast %70 : vector<8x32xf32> to vector<1x1x8x32xf32>
    tpu.vector_store %arg14[%c0_50, %c2_51, %c0_52, %c0_53], %73 {strides = array<i32>} : memref<1x4x8x32xf32, #tpu.memory_space<vmem>>, vector<1x1x8x32xf32>,
    %74 = vector.extract_strided_slice %61 {offsets = [0, 96], sizes = [8, 32], strides = [1, 1]} : vector<8x128xf32> to vector<8x32xf32>
    %c0_54 = arith.constant 0 : index
    %c3_55 = arith.constant 3 : index
    %c0_56 = arith.constant 0 : index
    %c0_57 = arith.constant 0 : index
    %75 = vector.load %arg14[%c0_54, %c3_55, %c0_56, %c0_57] : memref<1x4x8x32xf32, #tpu.memory_space<vmem>>, vector<1x1x8x32xf32>
    %76 = vector.shape_cast %75 : vector<1x1x8x32xf32> to vector<8x32xf32>
    %77 = vector.shape_cast %74 : vector<8x32xf32> to vector<1x1x8x32xf32>
    tpu.vector_store %arg14[%c0_54, %c3_55, %c0_56, %c0_57], %77 {strides = array<i32>} : memref<1x4x8x32xf32, #tpu.memory_space<vmem>>, vector<1x1x8x32xf32>,
    %78 = vector.extract_strided_slice %6 {offsets = [0, 256], sizes = [8, 128], strides = [1, 1]} : vector<8x512xf32> to vector<8x128xf32>
    %79 = arith.subf %78, %61 : vector<8x128xf32>
    %cst_58 = arith.constant dense<0.000000e+00> : vector<8x4xf32>
    %80 = tpu.matmul %79, %7, %cst_58 {dimension_numbers = #tpu.dot_dimension_numbers<[1], [0], [0], [1], [0, 0, 1, 1], [], []>} : vector<8x128xf32>, vector<128x4xf32>, vector<8x4xf32> -> vector<8x4xf32>
    %cst_59 = arith.constant 3.125000e-02 : f32
    %81 = vector.broadcast %cst_59 : f32 to vector<8x4xf32>
    %82 = arith.mulf %80, %81 : vector<8x4xf32>
    %cst_60 = arith.constant dense<0.000000e+00> : vector<8x128xf32>
    %83 = tpu.matmul %82, %8, %cst_60 {dimension_numbers = #tpu.dot_dimension_numbers<[1], [0], [0], [1], [0, 0, 1, 1], [], []>} : vector<8x4xf32>, vector<4x128xf32>, vector<8x128xf32> -> vector<8x128xf32>
    %84 = arith.subf %79, %83 : vector<8x128xf32>
    %85 = arith.mulf %84, %84 : vector<8x128xf32>
    %cst_61 = arith.constant dense<0.000000e+00> : vector<8x4xf32>
    %86 = tpu.matmul %85, %7, %cst_61 {dimension_numbers = #tpu.dot_dimension_numbers<[1], [0], [0], [1], [0, 0, 1, 1], [], []>} : vector<8x128xf32>, vector<128x4xf32>, vector<8x4xf32> -> vector<8x4xf32>
    %cst_62 = arith.constant 0.0322580636 : f32
    %87 = vector.broadcast %cst_62 : f32 to vector<8x4xf32>
    %88 = arith.mulf %86, %87 : vector<8x4xf32>
    %89 = math.sqrt %88 : vector<8x4xf32>
    %cst_63 = arith.constant 9.99999993E-9 : f32
    %90 = vector.broadcast %cst_63 : f32 to vector<8x4xf32>
    %91 = arith.addf %89, %90 : vector<8x4xf32>
    %cst_64 = arith.constant 1.000000e+00 : f32
    %92 = vector.broadcast %cst_64 : f32 to vector<8x4xf32>
    %93 = arith.divf %92, %91 : vector<8x4xf32>
    %cst_65 = arith.constant dense<0.000000e+00> : vector<8x128xf32>
    %94 = tpu.matmul %93, %8, %cst_65 {dimension_numbers = #tpu.dot_dimension_numbers<[1], [0], [0], [1], [0, 0, 1, 1], [], []>} : vector<8x4xf32>, vector<4x128xf32>, vector<8x128xf32> -> vector<8x128xf32>
    %95 = arith.mulf %84, %94 : vector<8x128xf32>
    %c0_66 = arith.constant 0 : index
    %c0_67 = arith.constant 0 : index
    %96 = vector.load %arg11[%c0_66, %c0_67] : memref<1x128xf32, #tpu.memory_space<vmem>>, vector<1x128xf32>
    %97 = vector.broadcast %96 : vector<1x128xf32> to vector<8x128xf32>
    %98 = arith.mulf %97, %95 : vector<8x128xf32>
    %c0_68 = arith.constant 0 : index
    %c0_69 = arith.constant 0 : index
    %99 = vector.load %arg12[%c0_68, %c0_69] : memref<1x128xf32, #tpu.memory_space<vmem>>, vector<1x128xf32>
    %100 = vector.broadcast %99 : vector<1x128xf32> to vector<8x128xf32>
    %101 = arith.addf %98, %100 : vector<8x128xf32>
    %102 = arith.addf %101, %61 : vector<8x128xf32>
    %103 = vector.extract_strided_slice %102 {offsets = [0, 0], sizes = [8, 32], strides = [1, 1]} : vector<8x128xf32> to vector<8x32xf32>
    %c0_70 = arith.constant 0 : index
    %c0_71 = arith.constant 0 : index
    %c0_72 = arith.constant 0 : index
    %c0_73 = arith.constant 0 : index
    %104 = vector.load %arg15[%c0_70, %c0_71, %c0_72, %c0_73] : memref<1x4x8x32xf32, #tpu.memory_space<vmem>>, vector<1x1x8x32xf32>
    %105 = vector.shape_cast %104 : vector<1x1x8x32xf32> to vector<8x32xf32>
    %106 = vector.shape_cast %103 : vector<8x32xf32> to vector<1x1x8x32xf32>
    tpu.vector_store %arg15[%c0_70, %c0_71, %c0_72, %c0_73], %106 {strides = array<i32>} : memref<1x4x8x32xf32, #tpu.memory_space<vmem>>, vector<1x1x8x32xf32>,
    %107 = vector.extract_strided_slice %102 {offsets = [0, 32], sizes = [8, 32], strides = [1, 1]} : vector<8x128xf32> to vector<8x32xf32>
    %c0_74 = arith.constant 0 : index
    %c1_75 = arith.constant 1 : index
    %c0_76 = arith.constant 0 : index
    %c0_77 = arith.constant 0 : index
    %108 = vector.load %arg15[%c0_74, %c1_75, %c0_76, %c0_77] : memref<1x4x8x32xf32, #tpu.memory_space<vmem>>, vector<1x1x8x32xf32>
    %109 = vector.shape_cast %108 : vector<1x1x8x32xf32> to vector<8x32xf32>
    %110 = vector.shape_cast %107 : vector<8x32xf32> to vector<1x1x8x32xf32>
    tpu.vector_store %arg15[%c0_74, %c1_75, %c0_76, %c0_77], %110 {strides = array<i32>} : memref<1x4x8x32xf32, #tpu.memory_space<vmem>>, vector<1x1x8x32xf32>,
    %111 = vector.extract_strided_slice %102 {offsets = [0, 64], sizes = [8, 32], strides = [1, 1]} : vector<8x128xf32> to vector<8x32xf32>
    %c0_78 = arith.constant 0 : index
    %c2_79 = arith.constant 2 : index
    %c0_80 = arith.constant 0 : index
    %c0_81 = arith.constant 0 : index
    %112 = vector.load %arg15[%c0_78, %c2_79, %c0_80, %c0_81] : memref<1x4x8x32xf32, #tpu.memory_space<vmem>>, vector<1x1x8x32xf32>
    %113 = vector.shape_cast %112 : vector<1x1x8x32xf32> to vector<8x32xf32>
    %114 = vector.shape_cast %111 : vector<8x32xf32> to vector<1x1x8x32xf32>
    tpu.vector_store %arg15[%c0_78, %c2_79, %c0_80, %c0_81], %114 {strides = array<i32>} : memref<1x4x8x32xf32, #tpu.memory_space<vmem>>, vector<1x1x8x32xf32>,
    %115 = vector.extract_strided_slice %102 {offsets = [0, 96], sizes = [8, 32], strides = [1, 1]} : vector<8x128xf32> to vector<8x32xf32>
    %c0_82 = arith.constant 0 : index
    %c3_83 = arith.constant 3 : index
    %c0_84 = arith.constant 0 : index
    %c0_85 = arith.constant 0 : index
    %116 = vector.load %arg15[%c0_82, %c3_83, %c0_84, %c0_85] : memref<1x4x8x32xf32, #tpu.memory_space<vmem>>, vector<1x1x8x32xf32>
    %117 = vector.shape_cast %116 : vector<1x1x8x32xf32> to vector<8x32xf32>
    %118 = vector.shape_cast %115 : vector<8x32xf32> to vector<1x1x8x32xf32>
    tpu.vector_store %arg15[%c0_82, %c3_83, %c0_84, %c0_85], %118 {strides = array<i32>} : memref<1x4x8x32xf32, #tpu.memory_space<vmem>>, vector<1x1x8x32xf32>,
    %119 = vector.extract_strided_slice %6 {offsets = [0, 384], sizes = [8, 128], strides = [1, 1]} : vector<8x512xf32> to vector<8x128xf32>
    %120 = arith.negf %119 : vector<8x128xf32>
    %121 = math.exp %120 : vector<8x128xf32>
    %cst_86 = arith.constant 1.000000e+00 : f32
    %122 = vector.broadcast %cst_86 : f32 to vector<8x128xf32>
    %123 = arith.addf %122, %121 : vector<8x128xf32>
    %124 = arith.divf %122, %123 : vector<8x128xf32>
    %c0_87 = arith.constant 0 : index
    %c0_88 = arith.constant 0 : index
    %c0_89 = arith.constant 0 : index
    %125 = vector.load %arg16[%c0_87, %c0_88, %c0_89] : memref<1x8x128xf32, #tpu.memory_space<vmem>>, vector<1x8x128xf32>
    %126 = vector.shape_cast %125 : vector<1x8x128xf32> to vector<8x128xf32>
    %127 = vector.shape_cast %124 : vector<8x128xf32> to vector<1x8x128xf32>
    tpu.vector_store %arg16[%c0_87, %c0_88, %c0_89], %127 {strides = array<i32>} : memref<1x8x128xf32, #tpu.memory_space<vmem>>, vector<1x8x128xf32>,
    return
  }
  func.func @transform_0(%arg0: i32, %arg1: i32) -> (i32, i32, i32) {
    %c0_i32 = arith.constant 0 : i32
    %c0_i32_0 = arith.constant 0 : i32
    return %arg0, %arg1, %c0_i32 : i32, i32, i32
  }
  func.func @transform_1(%arg0: i32, %arg1: i32) -> (i32, i32) {
    %c0_i32 = arith.constant 0 : i32
    %c0_i32_0 = arith.constant 0 : i32
    %c0_i32_1 = arith.constant 0 : i32
    return %c0_i32, %c0_i32_0 : i32, i32
  }
  func.func @transform_2(%arg0: i32, %arg1: i32) -> (i32, i32) {
    %c0_i32 = arith.constant 0 : i32
    %c0_i32_0 = arith.constant 0 : i32
    %c0_i32_1 = arith.constant 0 : i32
    return %c0_i32, %c0_i32_0 : i32, i32
  }
  func.func @transform_3(%arg0: i32, %arg1: i32) -> (i32, i32) {
    %c0_i32 = arith.constant 0 : i32
    %c0_i32_0 = arith.constant 0 : i32
    return %arg1, %c0_i32 : i32, i32
  }
  func.func @transform_4(%arg0: i32, %arg1: i32) -> (i32, i32) {
    %c0_i32 = arith.constant 0 : i32
    %c0_i32_0 = arith.constant 0 : i32
    return %arg1, %c0_i32 : i32, i32
  }
  func.func @transform_5(%arg0: i32, %arg1: i32) -> (i32, i32) {
    %c0_i32 = arith.constant 0 : i32
    %c0_i32_0 = arith.constant 0 : i32
    return %arg1, %c0_i32 : i32, i32
  }
  func.func @transform_6(%arg0: i32, %arg1: i32) -> (i32, i32) {
    %c0_i32 = arith.constant 0 : i32
    %c0_i32_0 = arith.constant 0 : i32
    %c0_i32_1 = arith.constant 0 : i32
    return %c0_i32, %c0_i32_0 : i32, i32
  }
  func.func @transform_7(%arg0: i32, %arg1: i32) -> (i32, i32) {
    %c0_i32 = arith.constant 0 : i32
    %c0_i32_0 = arith.constant 0 : i32
    %c0_i32_1 = arith.constant 0 : i32
    return %c0_i32, %c0_i32_0 : i32, i32
  }
  func.func @transform_8(%arg0: i32, %arg1: i32) -> (i32, i32) {
    %c0_i32 = arith.constant 0 : i32
    %c0_i32_0 = arith.constant 0 : i32
    %c0_i32_1 = arith.constant 0 : i32
    return %c0_i32, %c0_i32_0 : i32, i32
  }
  func.func @transform_9(%arg0: i32, %arg1: i32) -> (i32, i32) {
    %c0_i32 = arith.constant 0 : i32
    %c0_i32_0 = arith.constant 0 : i32
    %c0_i32_1 = arith.constant 0 : i32
    return %c0_i32, %c0_i32_0 : i32, i32
  }
  func.func @transform_10(%arg0: i32, %arg1: i32) -> (i32, i32) {
    %c0_i32 = arith.constant 0 : i32
    %c0_i32_0 = arith.constant 0 : i32
    %c0_i32_1 = arith.constant 0 : i32
    return %c0_i32, %c0_i32_0 : i32, i32
  }
  func.func @transform_11(%arg0: i32, %arg1: i32) -> (i32, i32, i32, i32) {
    %c0_i32 = arith.constant 0 : i32
    %c0_i32_0 = arith.constant 0 : i32
    %c0_i32_1 = arith.constant 0 : i32
    return %arg0, %c0_i32, %arg1, %c0_i32_0 : i32, i32, i32, i32
  }
  func.func @transform_12(%arg0: i32, %arg1: i32) -> (i32, i32, i32, i32) {
    %c0_i32 = arith.constant 0 : i32
    %c0_i32_0 = arith.constant 0 : i32
    %c0_i32_1 = arith.constant 0 : i32
    return %arg0, %c0_i32, %arg1, %c0_i32_0 : i32, i32, i32, i32
  }
  func.func @transform_13(%arg0: i32, %arg1: i32) -> (i32, i32, i32, i32) {
    %c0_i32 = arith.constant 0 : i32
    %c0_i32_0 = arith.constant 0 : i32
    %c0_i32_1 = arith.constant 0 : i32
    return %arg0, %c0_i32, %arg1, %c0_i32_0 : i32, i32, i32, i32
  }
  func.func @transform_14(%arg0: i32, %arg1: i32) -> (i32, i32, i32) {
    %c0_i32 = arith.constant 0 : i32
    %c0_i32_0 = arith.constant 0 : i32
    return %arg0, %arg1, %c0_i32 : i32, i32, i32
  }
}

</mosaic_0001>

<bundles_post_ra>
// kernel: tpu_custom_call.1
= control target key start
LH: loop header
LB: loop body
LE: loop exit
PB: predicated region body
PF: predicated region fallthrough
CT: control target
= control target key end

     0   :  { %s3495_s0 = inlined_call_operand.vmem [shape: f32[2,16,128], index: 0, kind: input, shape index: {}]   ;;  %s3496_s1 = inlined_call_operand.hbm [shape: f32[128,512], index: 1, kind: input, shape index: {}]   ;;  %s3497_s2 = inlined_call_operand.vmem [shape: f32[1,512], index: 2, kind: input, shape index: {}]   ;;  %s3498_s3 = inlined_call_operand.vmem [shape: f32[16,32], index: 3, kind: input, shape index: {}]   ;;  %s3499_s4 = inlined_call_operand.vmem [shape: f32[16,32], index: 4, kind: input, shape index: {}]   ;;  %s3500_s5 = inlined_call_operand.vmem [shape: f32[16,32], index: 5, kind: input, shape index: {}]   ;;  %s3501_s6 = inlined_call_operand.vmem [shape: f32[128,4], index: 6, kind: input, shape index: {}]   ;;  %s3502_s7 = inlined_call_operand.vmem [shape: f32[4,128], index: 7, kind: input, shape index: {}]   ;;  %s3503_s8 = inlined_call_operand.vmem [shape: f32[32,128], index: 8, kind: input, shape index: {}]   ;;  %s3504_s9 = inlined_call_operand.vmem [shape: f32[1,128], index: 9, kind: input, shape index: {}]   ;;  %s3505_s10 = inlined_call_operand.vmem [shape: f32[1,128], index: 10, kind: input, shape index: {}]   ;;  %s3506_s11 = inlined_call_operand.hbm [shape: f32[2,4,16,32], index: 11, kind: output, shape index: {0}]   ;;  %s3507_s12 = inlined_call_operand.hbm [shape: f32[2,4,16,32], index: 12, kind: output, shape index: {1}]   ;;  %s3508_s13 = inlined_call_operand.hbm [shape: f32[2,4,16,32], index: 13, kind: output, shape index: {2}]   ;;  %s3509_s14 = inlined_call_operand.hbm [shape: f32[2,16,128], index: 14, kind: output, shape index: {3}]  }
   0x1   :  { %3524 = sst [smem:[#allocation19_spill]] %s3495_s0 }
   0x2   :  { %3525 = sst [smem:[#allocation20_spill]] %s3496_s1 }
   0x3   :  { %3526 = sst [smem:[#allocation21_spill]] %s3497_s2 }
   0x4   :  { %3527 = sst [smem:[#allocation22_spill]] %s3498_s3 }
   0x5   :  { %3528 = sst [smem:[#allocation23_spill]] %s3499_s4 }
   0x6   :  { %3529 = sst [smem:[#allocation24_spill]] %s3500_s5 }
   0x7   :  { %3530 = sst [smem:[#allocation25_spill]] %s3501_s6 }
   0x8   :  { %3531 = sst [smem:[#allocation26_spill]] %s3502_s7 }
   0x9   :  { %3532 = sst [smem:[#allocation27_spill]] %s3503_s8 }
   0xa   :  { %3533 = sst [smem:[#allocation28_spill]] %s3504_s9 }
   0xb   :  { %3534 = sst [smem:[#allocation29_spill]] %s3505_s10 }
   0xc   :  { %3535 = sst [smem:[#allocation30_spill]] %s3506_s11 }
   0xd   :  { %3536 = sst [smem:[#allocation31_spill]] %s3507_s12 }
   0xe   :  { %3537 = sst [smem:[#allocation32_spill]] %s3508_s13 }
   0xf   :  { %3538 = sst [smem:[#allocation33_spill]] %s3509_s14 }
  0x10   :  { %20 = vsyncpa [#allocation3], 0 }
  0x11   :  { %21 = vsyncpa [#allocation4], 0 }
  0x12   :  { %23 = vsyncpa [#allocation4 + $0x1], 0 }
  0x13   :  { %24 = vsyncpa [#allocation7], 0 }
  0x14   :  { %26 = vsyncpa [#allocation7 + $0x1], 0 }
  0x15   :  { %27 = vsyncpa [#allocation10], 0 }
  0x16   :  { %29 = vsyncpa [#allocation10 + $0x1], 0  ;;  %s2825_s29 = smov 0   ;;  %s2827_s30 = smov 0  }
  0x17   :  { %s2829_s15 = smov 0   ;;  %s2831_s16 = smov 0  }
  0x18   :  { %s2833_s17 = smov 0   ;;  %s2835_s18 = smov 0  }
  0x19   :  { %s2837_s19 = smov 0   ;;  %s2839_s20 = smov 0  }
  0x1a LB: > { %3539 = sst [smem:[#allocation15_spill]] %s2703_s29  ;;  %s2866_s21 = sadd.s32 4294967295, %s2731_s20   ;;  %s2731_s20 = sphi %s2839_s20, %s35_s20   ;;  %s2727_s19 = sphi %s2837_s19, %s3576_s19   ;;  %s2723_s18 = sphi %s2835_s18, %s3570_s18   ;;  %s2719_s17 = sphi %s2833_s17, %s3575_s17   ;;  %s2715_s16 = sphi %s2831_s16, %s3569_s16   ;;  %s2711_s15 = sphi %s2829_s15, %s3574_s15   ;;  %s2707_s30 = sphi %s2827_s30, %s3573_s30   ;;  %s2703_s29 = sphi %s2825_s29, %s3572_s29  }
  0x1b   : > { %3540 = sst [smem:[#allocation16_spill]] %s2723_s18  ;;  %s3513_s22 = sadd.s32 4294967294, %s2731_s20  }
  0x1c   : > { %s44_s23 = sadd.s32 1, %s2723_s18  ;;  %s47_s24 = sadd.s32 1, %s2727_s19 }
  0x1d   : > { %p45_p0 = scmp.ge.s32.totalorder %s44_s23, 2  ;;  %s309_s25 = sadd.s32 1, %s2711_s15 }
  0x1e   : > { %p319_p1 = scmp.ne.s32.totalorder %s2711_s15, %s2707_s30  ;;  %p320_p2 = scmp.eq.s32.totalorder %s2866_s21, 3 }
  0x1f   : > { %s3578_s23 = smov (%p45_p0, %s44_s23), 0  ;;  %s3580_s24 = smov (!%p45_p0, %s47_s24), %s2727_s19 }
  0x20   : > { %3541 = sst [smem:[#allocation17_spill]] %s3578_s23  ;;  %s305_s26 = ssub.s32 %s2723_s18, %s3578_s23 }
  0x21   : > { %p2880_p3 = por %p320_p2, %p319_p1  ;;  %p49_p4 = scmp.ge.s32.totalorder %s3580_s24, 2 }
  0x22   : > { %p325_p5 = scmp.ne.s32.totalorder %s2707_s30, %s2703_s29  ;;  %p326_p6 = scmp.eq.s32.totalorder %s3513_s22, 3 }
  0x23   : > { %p2067_p7 = scmp.ge.s32.totalorder %s2731_s20, 1  ;;  %s3582_s24 = smov (%p49_p4, %s3580_s24), 0 }
  0x24   : > { %3543 = sst [smem:[#allocation18_spill]] %s3582_s24  ;;  %p2891_p8 = por %p326_p6, %p325_p5 }
  0x25   : > { %p417_p9 = scmp.lt.s32.totalorder %s2731_s20, 5  ;;  %s304_s13 = ssub.s32 %s2727_s19, %s3582_s24 }
  0x26   : > { %s306_s23 = sor.u32 %s305_s26, %s304_s13  ;;  %p2431_p12 = scmp.eq.s32.totalorder %s2866_s21, 0 }
  0x27   : > { %p2898_p10 = pnand %p2067_p7, %p417_p9  ;;  %p307_p11 = scmp.eq.s32.totalorder %s306_s23, 0 }
  0x28   : > { %s2733_s29 = smov [#allocation2]  }
  0x29   : > { %p2414_p13 = pneg %p2898_p10  ;;  %s429_s14 = sshll.u32 %s2733_s29, 4  ;;  %s430_s14 = int_to_ptr.vmem [resolvable:$true] %s429_s14 }
  0x2a   : > { %s2906_s22 = scalar_select %p307_p11, %s2711_s15, %s309_s25  }
  0x2b   : > { %p2910_p0 = pnand %p2431_p12, %p2414_p13  ;;  %s2534_s13 = scalar_lea.vmem %s430_s14, 8192 }
  0x2c   : > { %p2535_p2 = scmp.ne.s32.totalorder %s430_s14, %s2534_s13  ;;  %p2542_p6 = scmp.lt.s32.totalorder %s430_s14, %s430_s14 }
  0x2d   : > { %p2525_p1 = pneg %p2910_p0  ;;  %p2543_p7 = scmp.lt.s32.totalorder %s2534_s13, %s2534_s13 }
  0x2f   : > { %p2537_p4 = pnand %p2535_p2, %p2525_p1  ;;  %p2544_p9 = por %p2543_p7, %p2542_p6 }
  0x31   : > { %p2538_p5 = pneg %p2537_p4 }
  0x33   : > { %p2545_p11 = pnand %p2544_p9, %p2538_p5 }
  0x35   : > { %2548 = shalt.err (!%p2545_p11)
}
  0x36   : > { %s2734_s23 = smov 512   ;;  %s2735_s29 = smov 32  }
  0x37   : > { %s3547_s1 = sld [smem:[#allocation20_spill]] }
  0x39   : > { %495 = sbr.rel (%p2898_p10) target bundleno = 1838 (0x72e), region = 64 }
  0x3d   : > { %2417 = dma.hbm_to_vmem [thread:$0]  (!%p2910_p0), %s3547_s1, 8192, %s430_s14, [#allocation3], %s2734_s23, %s2734_s23, %s2735_s29  }
  0x3e   : > { %2686 = dma.done.wait (%p2431_p12), [#allocation3], 8192  }
  0x3f   : > { %2688 = vsyncadd (%p2431_p12), [#allocation3], 4294959104  ;;  %v2736_v0 = vmov 0.0   ;;  %v653_v1 = vld [vmem:[#allocation2 + $0x1e8] sm:$0xff]  ;;  %v652_v2 = vld [vmem:[#allocation2 + $0x1e0] sm:$0xff]  ;;  %p571_p10 = scmp.lt.s32.totalorder %s2719_s17, 1 }
  0x40   : > { %742 = vmatprep.mubr.f32.mxu0 %v2736_v0  ;;  %813 = vmatprep.mubr.f32.mxu1 %v2736_v0  ;;  %v649_v3 = vld [vmem:[#allocation2 + $0x1c8] sm:$0xff]  ;;  %v648_v4 = vld [vmem:[#allocation2 + $0x1c0] sm:$0xff]  ;;  %v655_v15 = vld [vmem:[#allocation2 + $0x1f8] sm:$0xff]  ;;  %p573_p12 = scmp.lt.s32.totalorder %s2715_s16, 1  ;;  %s3548_s0 = sld [smem:[#allocation19_spill]]  ;;  %vm2737_vm0 = vmmov 0  }
  0x41   : > { %678 = vmatprep.subr.mxu0 %v653_v1  ;;  %v645_v5 = vld [vmem:[#allocation2 + $0x1a8] sm:$0xff]  ;;  %v644_v6 = vld [vmem:[#allocation2 + $0x1a0] sm:$0xff]  ;;  %v654_v16 = vld [vmem:[#allocation2 + $0x1f0] sm:$0xff]  ;;  %749 = vmatprep.subr.mxu1 %v655_v15  ;;  %s2934_s11 = scalar_select %p571_p10, %s2719_s17, 1  ;;  %vm842_vm1 = vcmask 261120   ;;  %vm1141_vm2 = vcmask 1043456  }
  0x42   : > { %679 = vmatpush1.msra.mxu0 %v652_v2  ;;  %v641_v7 = vld [vmem:[#allocation2 + $0x188] sm:$0xff]  ;;  %v640_v8 = vld [vmem:[#allocation2 + $0x180] sm:$0xff]  ;;  %v651_v17 = vld [vmem:[#allocation2 + $0x1d8] sm:$0xff]  ;;  %750 = vmatpush1.msra.mxu1 %v654_v16  ;;  %s2939_s14 = scalar_select %p573_p12, %s2715_s16, 1  ;;  %vm1137_vm3 = vcmask 31744  }
  0x43   : > { %680 = vmatprep.subr.mxu0 %v649_v3  ;;  %v637_v9 = vld [vmem:[#allocation2 + $0x168] sm:$0xff]  ;;  %v636_v10 = vld [vmem:[#allocation2 + $0x160] sm:$0xff]  ;;  %v650_v19 = vld [vmem:[#allocation2 + $0x1d0] sm:$0xff]  ;;  %751 = vmatprep.subr.mxu1 %v651_v17  ;;  %s2076_s18 = sshll.u32 %s2934_s11, 1  ;;  %s3549_s8 = sld [smem:[#allocation27_spill]] }
  0x44   : > { %681 = vmatpush1.msra.mxu0 %v648_v4  ;;  %v633_v11 = vld [vmem:[#allocation2 + $0x148] sm:$0xff]  ;;  %v632_v12 = vld [vmem:[#allocation2 + $0x140] sm:$0xff]  ;;  %v647_v21 = vld [vmem:[#allocation2 + $0x1b8] sm:$0xff]  ;;  %752 = vmatpush1.msra.mxu1 %v650_v19  ;;  %s576_s13 = sadd.s32 %s2076_s18, %s2939_s14  ;;  %s2954_s29 = sshll.u32 %s2939_s14, 3 }
  0x45   : > { %682 = vmatprep.subr.mxu0 %v645_v5  ;;  %v629_v13 = vld [vmem:[#allocation2 + $0x128] sm:$0xff]  ;;  %v628_v14 = vld [vmem:[#allocation2 + $0x120] sm:$0xff]  ;;  %v646_v23 = vld [vmem:[#allocation2 + $0x1b0] sm:$0xff]  ;;  %753 = vmatprep.subr.mxu1 %v647_v21  ;;  %s2077_s23 = sshll.u32 %s576_s13, 3  ;;  %s3550_s3 = sld [smem:[#allocation22_spill]] }
  0x46   : > { %683 = vmatpush1.msra.mxu0 %v644_v6  ;;  %v625_v18 = vld [vmem:[#allocation2 + $0x108] sm:$0xff]  ;;  %v624_v20 = vld [vmem:[#allocation2 + $0x100] sm:$0xff]  ;;  %v643_v25 = vld [vmem:[#allocation2 + $0x198] sm:$0xff]  ;;  %754 = vmatpush1.msra.mxu1 %v646_v23  ;;  %s578_s26 = scalar_lea.vmem %s3548_s0, %s2077_s23  ;;  %s3551_s4 = sld [smem:[#allocation23_spill]] }
  0x47   : > { %684 = vmatprep.subr.mxu0 %v641_v7  ;;  %v621_v22 = vld [vmem:[#allocation2 + $0xe8] sm:$0xff]  ;;  %v620_v24 = vld [vmem:[#allocation2 + $0xe0] sm:$0xff]  ;;  %v642_v27 = vld [vmem:[#allocation2 + $0x190] sm:$0xff]  ;;  %755 = vmatprep.subr.mxu1 %v643_v25  ;;  %s3552_s5 = sld [smem:[#allocation24_spill]]  ;;  %s3519_s18 = smov 64  }
  0x48   : > { %685 = vmatpush1.msra.mxu0 %v640_v8  ;;  %v617_v26 = vld [vmem:[#allocation2 + $0xc8] sm:$0xff]  ;;  %v616_v28 = vld [vmem:[#allocation2 + $0xc0] sm:$0xff]  ;;  %v639_v29 = vld [vmem:[#allocation2 + $0x178] sm:$0xff]  ;;  %756 = vmatpush1.msra.mxu1 %v642_v27  ;;  %s3553_s6 = sld [smem:[#allocation25_spill]]  ;;  %s1763_s1 = sand.u32 1, %s2866_s21  }
  0x49   : > { %686 = vmatprep.subr.mxu0 %v637_v9  ;;  %v613_v30 = vld [vmem:[#allocation2 + $0xa8] sm:$0xff]  ;;  %v638_v31 = vld [vmem:[#allocation2 + $0x170] sm:$0xff]  ;;  %v612_v32 = vld [vmem:[#allocation2 + $0xa0] sm:$0xff]  ;;  %757 = vmatprep.subr.mxu1 %v639_v29  ;;  %s3554_s2 = sld [smem:[#allocation21_spill]] }
  0x4a   : > { %687 = vmatpush1.msra.mxu0 %v636_v10  ;;  %v635_v33 = vld [vmem:[#allocation2 + $0x158] sm:$0xff]  ;;  %v609_v34 = vld [vmem:[#allocation2 + $0x88] sm:$0xff]  ;;  %v634_v35 = vld [vmem:[#allocation2 + $0x150] sm:$0xff]  ;;  %758 = vmatpush1.msra.mxu1 %v638_v31  ;;  %s3555_s7 = sld [smem:[#allocation26_spill]] }
  0x4b   : > { %688 = vmatprep.subr.mxu0 %v633_v11  ;;  %v608_v36 = vld [vmem:[#allocation2 + $0x80] sm:$0xff]  ;;  %v631_v37 = vld [vmem:[#allocation2 + $0x138] sm:$0xff]  ;;  %v605_v38 = vld [vmem:[#allocation2 + $0x68] sm:$0xff]  ;;  %759 = vmatprep.subr.mxu1 %v635_v33  ;;  %s582_s23 = scalar_lea.vmem %s3550_s3, %s2954_s29  ;;  %s3556_s9 = sld [smem:[#allocation28_spill]] }
  0x4c   : > { %689 = vmatpush1.msra.mxu0 %v632_v12  ;;  %v630_v39 = vld [vmem:[#allocation2 + $0x130] sm:$0xff]  ;;  %v604_v40 = vld [vmem:[#allocation2 + $0x60] sm:$0xff]  ;;  %760 = vmatpush1.msra.mxu1 %v634_v35  ;;  %v627_v41 = vld [vmem:[#allocation2 + $0x118] sm:$0xff]  ;;  %s586_s11 = scalar_lea.vmem %s3551_s4, %s2954_s29  ;;  %s3557_s10 = sld [smem:[#allocation29_spill]] }
  0x4d   : > { %690 = vmatprep.subr.mxu0 %v629_v13  ;;  %v601_v42 = vld [vmem:[#allocation2 + $0x48] sm:$0xff]  ;;  %761 = vmatprep.subr.mxu1 %v631_v37  ;;  %v626_v43 = vld [vmem:[#allocation2 + $0x110] sm:$0xff]  ;;  %v600_v44 = vld [vmem:[#allocation2 + $0x40] sm:$0xff]  ;;  %s590_s13 = scalar_lea.vmem %s3552_s5, %s2954_s29  ;;  %s3558_s12 = sld [smem:[#allocation31_spill]] }
  0x4e   : > { %691 = vmatpush1.msra.mxu0 %v628_v14  ;;  %762 = vmatpush1.msra.mxu1 %v630_v39  ;;  %v623_v45 = vld [vmem:[#allocation2 + $0xf8] sm:$0xff]  ;;  %v597_v46 = vld [vmem:[#allocation2 + $0x28] sm:$0xff]  ;;  %v622_v47 = vld [vmem:[#allocation2 + $0xf0] sm:$0xff]  ;;  %s2743_s3 = smov [#allocation6]  }
  0x4f   : > { %692 = vmatprep.subr.mxu0 %v625_v18  ;;  %763 = vmatprep.subr.mxu1 %v627_v41  ;;  %v596_v48 = vld [vmem:[#allocation2 + $0x20] sm:$0xff]  ;;  %v619_v49 = vld [vmem:[#allocation2 + $0xd8] sm:$0xff]  ;;  %v593_v50 = vld [vmem:[#allocation2 + $0x8] sm:$0xff]  ;;  %s2553_s4 = sshll.u32 %s2743_s3, 4  ;;  %s2554_s4 = int_to_ptr.vmem [resolvable:$false] %s2553_s4 }
  0x50   : > { %693 = vmatpush1.msra.mxu0 %v624_v20  ;;  %764 = vmatpush1.msra.mxu1 %v626_v43  ;;  %v618_v51 = vld [vmem:[#allocation2 + $0xd0] sm:$0xff]  ;;  %v592_v52 = vld [vmem:[#allocation2] sm:$0xff]  ;;  %v615_v53 = vld [vmem:[#allocation2 + $0xb8] sm:$0xff] }
  0x51   : > { %694 = vmatprep.subr.mxu0 %v621_v22  ;;  %765 = vmatprep.subr.mxu1 %v623_v45  ;;  %v591_v54 = vld [vmem:[%s578_s26] sm:$0xff]  ;;  %v614_v55 = vld [vmem:[#allocation2 + $0xb0] sm:$0xff]  ;;  %v611_v56 = vld [vmem:[#allocation2 + $0x98] sm:$0xff]  ;;  %s3178_s26 = sand.u32 1, %s2707_s30  }
  0x52   : > { %695 = vmatpush1.msra.mxu0 %v620_v24  ;;  %766 = vmatpush1.msra.mxu1 %v622_v47  ;;  %v610_v57 = vld [vmem:[#allocation2 + $0x90] sm:$0xff]  ;;  %v840_v58 = vld [vmem:[%s3549_s8 + $0x18] sm:$0xff]  ;;  %v838_v1 = vld [vmem:[%s3549_s8 + $0x8] sm:$0xff]  ;;  %s3242_s25 = sshll.u32 %s3178_s26, 5 }
  0x53   : > { %696 = vmatprep.subr.mxu0 %v617_v26  ;;  %767 = vmatprep.subr.mxu1 %v619_v49  ;;  %v607_v59 = vld [vmem:[#allocation2 + $0x78] sm:$0xff]  ;;  %v606_v60 = vld [vmem:[#allocation2 + $0x70] sm:$0xff]  ;;  %v837_v4 = vld [vmem:[%s3549_s8] sm:$0xff]  ;;  %v658_v26 = vlaneseq  ;;  %s3252_s14 = scalar_lea.vmem [#allocation5], %s3242_s25 }
  0x54   : > { %697 = vmatpush1.msra.mxu0 %v616_v28  ;;  %768 = vmatpush1.msra.mxu1 %v618_v51  ;;  %v839_v61 = vld [vmem:[%s3549_s8 + $0x10] sm:$0xff]  ;;  %v603_v62 = vld [vmem:[#allocation2 + $0x58] sm:$0xff]  ;;  %v841_v7 = vld [vmem:[%s582_s23] sm:$0xff]  ;;  %s2739_s23 = smov 127   ;;  %s2555_s8 = scalar_lea.vmem %s2554_s4, 1024 }
  0x55   : > { %698 = vmatprep.subr.mxu0 %v613_v30  ;;  %769 = vmatprep.subr.mxu1 %v615_v53  ;;  %v602_v63 = vld [vmem:[#allocation2 + $0x50] sm:$0xff]  ;;  %v599_v2 = vld [vmem:[#allocation2 + $0x38] sm:$0xff]  ;;  %v916_v8 = vld [vmem:[%s586_s11] sm:$0xff]  ;;  %v3144_v27 = vshrl.u32 %v658_v26, 7  ;;  %s2075_s11 = sshll.u32 %s3178_s26, 3 }
  0x56   : > { %699 = vmatpush1.msra.mxu0 %v612_v32  ;;  %770 = vmatpush1.msra.mxu1 %v614_v55  ;;  %v598_v3 = vld [vmem:[#allocation2 + $0x30] sm:$0xff]  ;;  %v595_v5 = vld [vmem:[#allocation2 + $0x18] sm:$0xff]  ;;  %v990_v10 = vld [vmem:[%s590_s13] sm:$0xff]  ;;  %s3181_s29 = scalar_lea.vmem [#allocation9], %s2075_s11  ;;  %s2738_s13 = smov 1  }
  0x57   : > { %700 = vmatprep.subr.mxu0 %v609_v34  ;;  %771 = vmatprep.subr.mxu1 %v611_v56  ;;  %v594_v6 = vld [vmem:[#allocation2 + $0x10] sm:$0xff]  ;;  %v2992_v9 = vld [vmem:[%s3553_s6 + $0x78] sm:$0xff]  ;;  %v3010_v12 = vld [vmem:[%s3553_s6 + $0x68] sm:$0xff]  ;;  %v660_v28 = vsub.s32 0, %v3144_v27  ;;  %v664_v30 = vsub.s32 1, %v3144_v27  ;;  %v672_v41 = vsub.s32 3, %v3144_v27 }
  0x58   : > { %701 = vmatpush1.msra.mxu0 %v608_v36  ;;  %772 = vmatpush1.msra.mxu1 %v610_v57  ;;  %v3000_v11 = vld [vmem:[%s3553_s6 + $0x70] sm:$0xff]  ;;  %v3019_v13 = vld [vmem:[%s3553_s6 + $0x60] sm:$0xff]  ;;  %v3028_v14 = vld [vmem:[%s3553_s6 + $0x58] sm:$0xff]  ;;  %s3518_s11 = smov 96  }
  0x59   : > { %702 = vmatprep.subr.mxu0 %v605_v38  ;;  %773 = vmatprep.subr.mxu1 %v607_v59  ;;  %v3037_v15 = vld [vmem:[%s3553_s6 + $0x50] sm:$0xff]  ;;  %v3046_v16 = vld [vmem:[%s3553_s6 + $0x48] sm:$0xff]  ;;  %v3055_v17 = vld [vmem:[%s3553_s6 + $0x40] sm:$0xff] }
  0x5a   : > { %703 = vmatpush1.msra.mxu0 %v604_v40  ;;  %774 = vmatpush1.msra.mxu1 %v606_v60  ;;  %v3064_v18 = vld [vmem:[%s3553_s6 + $0x38] sm:$0xff]  ;;  %v3073_v19 = vld [vmem:[%s3553_s6 + $0x30] sm:$0xff]  ;;  %v3082_v20 = vld [vmem:[%s3553_s6 + $0x28] sm:$0xff] }
  0x5b   : > { %704 = vmatprep.subr.mxu0 %v601_v42  ;;  %775 = vmatprep.subr.mxu1 %v603_v62  ;;  %v3091_v21 = vld [vmem:[%s3553_s6 + $0x20] sm:$0xff]  ;;  %v3100_v22 = vld [vmem:[%s3553_s6 + $0x18] sm:$0xff]  ;;  %v3120_v23 = vld [vmem:[%s3553_s6 + $0x10] sm:$0xff] }
  0x5c   : > { %705 = vmatpush1.msra.mxu0 %v600_v44  ;;  %776 = vmatpush1.msra.mxu1 %v602_v63  ;;  %v3128_v24 = vld [vmem:[%s3553_s6 + $0x8] sm:$0xff]  ;;  %v3137_v25 = vld [vmem:[%s3553_s6] sm:$0xff] }
  0x5d   : > { %706 = vmatprep.subr.mxu0 %v597_v46  ;;  %777 = vmatprep.subr.mxu1 %v599_v2  ;;  %v3150_v29 = vld [vmem:[%s3554_s2] sm:$0xf] }
  0x5e   : > { %707 = vmatpush1.msra.mxu0 %v596_v48  ;;  %778 = vmatpush1.msra.mxu1 %v598_v3  ;;  %v661_v31 = vrot.slane %v3150_v29, %v660_v28  ;;  %v665_v32 = vrot.slane %v3150_v29, %v664_v30  ;;  %v673_v43 = vrot.slane %v3150_v29, %v672_v41 }
  0x5f   : > { %708 = vmatprep.subr.mxu0 %v593_v50  ;;  %779 = vmatprep.subr.mxu1 %v595_v5 }
  0x60   : > { %709 = vmatpush1.msra.mxu0 %v592_v52  ;;  %780 = vmatpush1.msra.mxu1 %v594_v6 }
  0x61   : > { %743 = vmatmul.mubr.f32.vlgmr.msra.gmra.mxu0 %v591_v54  ;;  %2209 = vmatprep.subr.mxu0 %v2736_v0 }
  0x62   : > { %2210 = vmatpush3.msra.mxu0 %v840_v58  ;;  %2217 = vmatprep.mubr.msk.f32.mxu0 %vm2737_vm0, %v2736_v0 }
  0x63   : > { %2211 = vmatprep.subr.mxu0 %v2736_v0  ;;  %814 = vmatmul.mubr.f32.vlgmr.msra.gmra.mxu1 %v591_v54  ;;  %v3187_v54 = vld [vmem:[%s3555_s7] sm:$0xf] }
  0x64   : > { %2212 = vmatpush3.msra.mxu0 %v839_v61  ;;  %2220 = vmatprep.subr.mxu1 %v2736_v0 }
  0x65   : > { %2213 = vmatprep.subr.mxu0 %v2736_v0  ;;  %2221 = vmatpush3.msra.mxu1 %v840_v58 }
  0x66   : > { %2214 = vmatpush3.msra.mxu0 %v838_v1  ;;  %2222 = vmatprep.subr.mxu1 %v2736_v0 }
  0x67   : > { %2215 = vmatprep.subr.mxu0 %v2736_v0  ;;  %2223 = vmatpush3.msra.mxu1 %v839_v61 }
  0x68   : > { %2216 = vmatpush3.msra.mxu0 %v837_v4  ;;  %2224 = vmatprep.subr.mxu1 %v2736_v0 }
  0x69   : > { %2231 = vmatprep.subr.mxu0 %v2736_v0  ;;  %2218 = vmatmul.mubr.msk.f32.vlgmr.msra.gmra.mxu0 %vm842_vm1, %v841_v7 }
  0x6a   : > { %2232 = vmatpush3.msra.mxu0 %v840_v58  ;;  %2225 = vmatpush3.msra.mxu1 %v838_v1 }
  0x6b   : > { %2233 = vmatprep.subr.mxu0 %v2736_v0  ;;  %2228 = vmatprep.mubr.msk.f32.mxu1 %vm2737_vm0, %v2736_v0 }
  0x6c   : > { %2234 = vmatpush3.msra.mxu0 %v839_v61  ;;  %2226 = vmatprep.subr.mxu1 %v2736_v0 }
  0x6d   : > { %2235 = vmatprep.subr.mxu0 %v2736_v0  ;;  %2227 = vmatpush3.msra.mxu1 %v837_v4 }
  0x6e   : > { %2236 = vmatpush3.msra.mxu0 %v838_v1  ;;  %2229 = vmatmul.mubr.msk.f32.vlgmr.msra.gmra.mxu1 %vm842_vm1, %v916_v8  ;;  %v668_v8 = vsub.s32 2, %v3144_v27 }
  0x6f   : > { %2237 = vmatprep.subr.mxu0 %v2736_v0  ;;  %2242 = vmatprep.subr.mxu1 %v2736_v0 }
  0x70   : > { %2238 = vmatpush3.msra.mxu0 %v837_v4  ;;  %2243 = vmatpush3.msra.mxu1 %v2992_v9 }
  0x71   : > { %2239 = vmatprep.mubr.msk.f32.mxu0 %vm2737_vm0, %v2736_v0  ;;  %2244 = vmatprep.subr.mxu1 %v2736_v0 }
  0x72   : > { %2282 = vmatprep.subr.mxu0 %v2736_v0  ;;  %2240 = vmatmul.mubr.msk.f32.vlgmr.msra.gmra.mxu0 %vm842_vm1, %v990_v10 }
  0x73   : > { %2245 = vmatpush3.msra.mxu1 %v3000_v11  ;;  %2283 = vmatpush3.msra.mxu0 %v2992_v9 }
  0x74   : > { %2246 = vmatprep.subr.mxu1 %v2736_v0  ;;  %2284 = vmatprep.subr.mxu0 %v2736_v0 }
  0x75   : > { %2247 = vmatpush3.msra.mxu1 %v3010_v12  ;;  %2285 = vmatpush3.msra.mxu0 %v3000_v11 }
  0x76   : > { %2248 = vmatprep.subr.mxu1 %v2736_v0  ;;  %2286 = vmatprep.subr.mxu0 %v2736_v0 }
  0x77   : > { %2249 = vmatpush3.msra.mxu1 %v3019_v13  ;;  %2287 = vmatpush3.msra.mxu0 %v3010_v12 }
  0x78   : > { %2250 = vmatprep.subr.mxu1 %v2736_v0  ;;  %2288 = vmatprep.subr.mxu0 %v2736_v0 }
  0x79   : > { %2251 = vmatpush3.msra.mxu1 %v3028_v14  ;;  %2289 = vmatpush3.msra.mxu0 %v3019_v13 }
  0x7a   : > { %2252 = vmatprep.subr.mxu1 %v2736_v0  ;;  %2290 = vmatprep.subr.mxu0 %v2736_v0 }
  0x7b   : > { %2253 = vmatpush3.msra.mxu1 %v3037_v15  ;;  %2291 = vmatpush3.msra.mxu0 %v3028_v14 }
  0x7c   : > { %2254 = vmatprep.subr.mxu1 %v2736_v0  ;;  %2292 = vmatprep.subr.mxu0 %v2736_v0 }
  0x7d   : > { %2255 = vmatpush3.msra.mxu1 %v3046_v16  ;;  %2293 = vmatpush3.msra.mxu0 %v3037_v15 }
  0x7e   : > { %2256 = vmatprep.subr.mxu1 %v2736_v0  ;;  %2294 = vmatprep.subr.mxu0 %v2736_v0 }
  0x7f   : > { %2257 = vmatpush3.msra.mxu1 %v3055_v17  ;;  %2295 = vmatpush3.msra.mxu0 %v3046_v16 }
  0x80   : > { %2258 = vmatprep.subr.mxu1 %v2736_v0  ;;  %2296 = vmatprep.subr.mxu0 %v2736_v0 }
  0x81   : > { %2259 = vmatpush3.msra.mxu1 %v3064_v18  ;;  %2297 = vmatpush3.msra.mxu0 %v3055_v17 }
  0x82   : > { %2260 = vmatprep.subr.mxu1 %v2736_v0  ;;  %2298 = vmatprep.subr.mxu0 %v2736_v0 }
  0x83   : > { %2261 = vmatpush3.msra.mxu1 %v3073_v19  ;;  %2299 = vmatpush3.msra.mxu0 %v3064_v18 }
  0x84   : > { %2262 = vmatprep.subr.mxu1 %v2736_v0  ;;  %2300 = vmatprep.subr.mxu0 %v2736_v0 }
  0x85   : > { %2263 = vmatpush3.msra.mxu1 %v3082_v20  ;;  %2301 = vmatpush3.msra.mxu0 %v3073_v19 }
  0x86   : > { %2264 = vmatprep.subr.mxu1 %v2736_v0  ;;  %2302 = vmatprep.subr.mxu0 %v2736_v0 }
  0x87   : > { %2265 = vmatpush3.msra.mxu1 %v3091_v21  ;;  %2303 = vmatpush3.msra.mxu0 %v3082_v20 }
  0x88   : > { %2266 = vmatprep.subr.mxu1 %v2736_v0  ;;  %2304 = vmatprep.subr.mxu0 %v2736_v0 }
  0x89   : > { %2267 = vmatpush3.msra.mxu1 %v3100_v22  ;;  %2305 = vmatpush3.msra.mxu0 %v3091_v21 }
  0x8a   : > { %2268 = vmatprep.subr.mxu1 %v2736_v0  ;;  %2306 = vmatprep.subr.mxu0 %v2736_v0 }
  0x8b   : > { %2274 = vmatprep.mubr.msk.f32.mxu1 %vm2737_vm0, %v2736_v0  ;;  %2307 = vmatpush3.msra.mxu0 %v3100_v22 }
  0x8c   : > { %2314 = vmatprep.mubr.msk.f32.mxu0 %vm2737_vm0, %v2736_v0  ;;  %2308 = vmatprep.subr.mxu0 %v2736_v0 }
  0x8d   : > { %2269 = vmatpush3.msra.mxu1 %v3120_v23  ;;  %2309 = vmatpush3.msra.mxu0 %v3120_v23 }
  0x8e   : > { %2270 = vmatprep.subr.mxu1 %v2736_v0  ;;  %2310 = vmatprep.subr.mxu0 %v2736_v0 }
  0x8f   : > { %2271 = vmatpush3.msra.mxu1 %v3128_v24  ;;  %2311 = vmatpush3.msra.mxu0 %v3128_v24 }
  0x90   : > { %2272 = vmatprep.subr.mxu1 %v2736_v0  ;;  %2312 = vmatprep.subr.mxu0 %v2736_v0 }
  0x91   : > { %2273 = vmatpush3.msra.mxu1 %v3137_v25  ;;  %2313 = vmatpush3.msra.mxu0 %v3137_v25 }
  0x92   : > { %2277 = vmatprep.subr.mxu1 %v2736_v0  ;;  %2357 = vmatprep.subr.mxu0 %v2736_v0 }
 0x121   : > { %v744_v33 = vpop.f32.mrf.mxu0 }
 0x122   : > { %v3155_v34 = vadd.f32 %v744_v33, %v661_v31  ;;  %v669_v33 = vrot.slane %v3150_v29, %v668_v8 }
 0x123   : > { %v746_v35 = vpop.f32.mrf.mxu0  ;;  %v3169_v40 = vpop.f32.mrf.mxu1 }
 0x124   : > { %v1064_v36 = vmul.f32 %v3155_v34, %v3155_v34  ;;  %v3159_v37 = vadd.f32 %v746_v35, %v665_v32  ;;  %v816_v29 = vadd.f32 %v3169_v40, %v669_v33 }
 0x125   : > { %v817_v44 = vpop.f32.mrf.mxu1 }
 0x126   : > { %v1242_v38 = vmul.f32 %v3159_v37, %v3159_v37  ;;  %2275 = vmatmul.mubr.f32.vlgmr.msra.gmra.mxu1 %v1064_v36  ;;  %v818_v46 = vadd.f32 %v817_v44, %v673_v43 }
 0x127   : > { %2279 = vmatprep.mubr.msk.f32.mxu1 %vm2737_vm0, %v2736_v0  ;;  %2278 = vmatpush3.msk.msra.mxu1 %vm1141_vm2, %v3187_v54 }
 0x128   : > { %2315 = vmatmul.mubr.f32.vlgmr.msra.gmra.mxu0 %v1242_v38  ;;  %v2103_v49 = vmul.f32 -1.442695, %v818_v46  ;;  %2317 = vmatprep.subr.mxu1 %v2736_v0 }
 0x129   : > { %2359 = vmatprep.mubr.msk.f32.mxu0 %vm2737_vm0, %v2736_v0  ;;  %v3167_v39 = vpop.f32.mrf.mxu0  ;;  %2358 = vmatpush3.msk.msra.mxu0 %vm1141_vm2, %v3187_v54 }
 0x12a   : > { %2511 = vpow2.f32 %v2103_v49  ;;  %2362 = vmatprep.subr.mxu0 %v2736_v0  ;;  %v2099_v49 = vld [vmem:[%s3557_s10] ss:$0 sm:$0xff] }
 0x12b   : > { %v2219_v42 = vpop.f32.mrf.mxu0 }
 0x12e   : > { %v3173_v45 = vpop.f32.mrf.mxu1 }
 0x130   : > { %v2230_v47 = vpop.f32.mrf.mxu1 }
 0x132   : > { %v3175_v48 = vpop.f32.mrf.mxu0 }
 0x134   : > { %v2241_v50 = vpop.f32.mrf.mxu0 }
 0x137   : > { %v2512_v51 = vpop.eup %2511 }
 0x138   : > { %v1754_v52 = vadd.f32 1.0, %v2512_v51 }
 0x13a   : > { %2513 = vrcp.f32 %v1754_v52 }
 0x147   : > { %v2514_v53 = vpop.eup %2513 }
 0x148   : > { %1757 = vst [vmem:[%s3181_s29] sm:$0xff] %v2514_v53 }
 0x1e6   : > { %v1131_v55 = vpop.f32.mrf.mxu1 }
 0x1e7   : > { %v1135_v56 = vmax.f32 %v1131_v55, 1e-24 }
 0x1e8   : > { %v2276_v57 = vpop.f32.mrf.mxu1  ;;  %v1309_v58 = vpop.f32.mrf.mxu0 }
 0x1e9   : > { %2515 = vrsqrt.f32 %v1135_v56  ;;  %v1313_v59 = vmax.f32 %v1309_v58, 1e-24 }
 0x1ea   : > { %v2316_v60 = vpop.f32.mrf.mxu0 }
 0x1eb   : > { %2517 = vrsqrt.f32 %v1313_v59 }
 0x1f6   : > { %v2516_v61 = vpop.eup %2515 }
 0x1f7   : > { %2280 = vmatmul.mubr.msk.f32.vlgmr.msra.gmra.mxu1 %vm1137_vm3, %v2516_v61 }
 0x1f8   : > { %2318 = vmatpush3.msk.msra.mxu1 %vm1141_vm2, %v3187_v54  ;;  %2319 = vmatprep.mubr.msk.f32.mxu1 %vm2737_vm0, %v2736_v0  ;;  %v2518_v62 = vpop.eup %2517 }
 0x1f9   : > { %2322 = vmatprep.subr.mxu1 %v2736_v0 }
 0x1fb   : > { %2320 = vmatmul.mubr.msk.f32.vlgmr.msra.gmra.mxu1 %vm1137_vm3, %v2518_v62 }
 0x1fc   : > { %2323 = vmatpush3.msra.mxu1 %v2992_v9  ;;  %2354 = vmatprep.mubr.msk.f32.mxu1 %vm2737_vm0, %v2736_v0 }
 0x1fd   : > { %2324 = vmatprep.subr.mxu1 %v2736_v0 }
 0x1fe   : > { %2325 = vmatpush3.msra.mxu1 %v3000_v11 }
 0x1ff   : > { %2326 = vmatprep.subr.mxu1 %v2736_v0 }
 0x200   : > { %2327 = vmatpush3.msra.mxu1 %v3010_v12 }
 0x201   : > { %2328 = vmatprep.subr.mxu1 %v2736_v0 }
 0x202   : > { %2329 = vmatpush3.msra.mxu1 %v3019_v13 }
 0x203   : > { %2330 = vmatprep.subr.mxu1 %v2736_v0 }
 0x204   : > { %2331 = vmatpush3.msra.mxu1 %v3028_v14 }
 0x205   : > { %2332 = vmatprep.subr.mxu1 %v2736_v0 }
 0x206   : > { %2333 = vmatpush3.msra.mxu1 %v3037_v15 }
 0x207   : > { %2334 = vmatprep.subr.mxu1 %v2736_v0 }
 0x208   : > { %2335 = vmatpush3.msra.mxu1 %v3046_v16 }
 0x209   : > { %2336 = vmatprep.subr.mxu1 %v2736_v0 }
 0x20a   : > { %2337 = vmatpush3.msra.mxu1 %v3055_v17 }
 0x20b   : > { %2338 = vmatprep.subr.mxu1 %v2736_v0 }
 0x20c   : > { %2339 = vmatpush3.msra.mxu1 %v3064_v18 }
 0x20d   : > { %2340 = vmatprep.subr.mxu1 %v2736_v0 }
 0x20e   : > { %2341 = vmatpush3.msra.mxu1 %v3073_v19 }
 0x20f   : > { %2342 = vmatprep.subr.mxu1 %v2736_v0 }
 0x210   : > { %2343 = vmatpush3.msra.mxu1 %v3082_v20 }
 0x211   : > { %2344 = vmatprep.subr.mxu1 %v2736_v0 }
 0x212   : > { %2345 = vmatpush3.msra.mxu1 %v3091_v21 }
 0x213   : > { %2346 = vmatprep.subr.mxu1 %v2736_v0 }
 0x214   : > { %2347 = vmatpush3.msra.mxu1 %v3100_v22 }
 0x215   : > { %2348 = vmatprep.subr.mxu1 %v2736_v0 }
 0x216   : > { %2349 = vmatpush3.msra.mxu1 %v3120_v23 }
 0x217   : > { %2350 = vmatprep.subr.mxu1 %v2736_v0 }
 0x218   : > { %2351 = vmatpush3.msra.mxu1 %v3128_v24 }
 0x219   : > { %2352 = vmatprep.subr.mxu1 %v2736_v0 }
 0x21a   : > { %2353 = vmatpush3.msra.mxu1 %v3137_v25 }
 0x21b   : > { %2397 = vmatprep.subr.mxu1 %v2736_v0 }
 0x2b7   : > { %v1211_v63 = vpop.f32.mrf.mxu1 }
 0x2b8   : > { %v1215_v1 = vmul.f32 %v1211_v63, %v3155_v34 }
 0x2b9   : > { %v2281_v2 = vpop.f32.mrf.mxu1 }
 0x2ba   : > { %1217 = vrot.lane.b32.xlu1 %v1215_v1, %s2738_s13  ;;  %v1216_v10 = vmul.f32 %v1215_v1, %v3167_v39 }
 0x2bb   : > { %v1384_v3 = vpop.f32.mrf.mxu1 }
 0x2bc   : > { %v1388_v4 = vmul.f32 %v1384_v3, %v3159_v37 }
 0x2bd   : > { %v2321_v5 = vpop.f32.mrf.mxu1 }
 0x2be   : > { %1221 = vrot.lane.b32.xlu1 %v1215_v1, %s2739_s23  ;;  %1390 = vrot.lane.b32.xlu0 %v1388_v4, %s2738_s13  ;;  %v1389_v35 = vmul.f32 %v1388_v4, %v3167_v39  ;;  %s3517_s13 = smov 32  }
 0x2c2   : > { %1394 = vrot.lane.b32.xlu0 %v1388_v4, %s2739_s23  ;;  %s3264_s23 = scalar_lea.vmem [#allocation6], %s3242_s25 }
 0x32c   : > { %v1218_v6 = vpop.permute.xlu1 %1217 }
 0x32d   : > { %v1219_v7 = vmul.f32 %v1218_v6, %v3173_v45 }
 0x32f   : > { %v1220_v30 = vadd.f32 %v1219_v7, %v1216_v10 }
 0x330   : > { %v1222_v26 = vpop.permute.xlu1 %1221  ;;  %v1391_v28 = vpop.permute.xlu0 %1390 }
 0x331   : > { %v1223_v31 = vmul.f32 %v1222_v26, %v3175_v48  ;;  %v1392_v32 = vmul.f32 %v1391_v28, %v3173_v45 }
 0x333   : > { %v1224_v34 = vsub.f32 %v1220_v30, %v1223_v31  ;;  %v1393_v27 = vadd.f32 %v1392_v32, %v1389_v35 }
 0x334   : > { %v1395_v36 = vpop.permute.xlu0 %1394 }
 0x335   : > { %v1396_v37 = vmul.f32 %v1395_v36, %v3175_v48  ;;  %1227 = vrot.lane.b32.xlu1 %v1224_v34, %s3518_s11  ;;  %1232 = vrot.lane.b32.xlu0 %v1224_v34, %s3519_s18  ;;  %1225 = vst.msk [vmem:[%s3252_s14] sm:$0xff] %vm842_vm1, %v1224_v34 }
 0x337   : > { %v3257_v38 = vsub.f32 %v1393_v27, %v1396_v37 }
 0x339   : > { %1237 = vrot.lane.b32.xlu1 %v1224_v34, %s3517_s13  ;;  %1400 = vrot.lane.b32.xlu0 %v3257_v38, %s3518_s11  ;;  %v1415_v39 = vsub.f32 %v816_v29, %v3257_v38  ;;  %1398 = vst.msk [vmem:[%s3264_s23] sm:$0xff] %vm842_vm1, %v3257_v38  ;;  %s1805_s11 = sshll.u32 %s3264_s23, 4  ;;  %s3328_s11 = int_to_ptr.vmem [resolvable:$true] %s1805_s11 }
 0x33a   : > { %p2556_p2 = scmp.lt.s32.totalorder %s3328_s11, %s2554_s4 }
 0x33b   : > { %2355 = vmatmul.mubr.f32.vlgmr.msra.gmra.mxu1 %v1415_v39 }
 0x33c   : > { %2398 = vmatpush3.msk.msra.mxu1 %vm1141_vm2, %v3187_v54  ;;  %2399 = vmatprep.mubr.msk.f32.mxu1 %vm2737_vm0, %v2736_v0 }
 0x33d   : > { %1405 = vrot.lane.b32.xlu1 %v3257_v38, %s3519_s18  ;;  %1410 = vrot.lane.b32.xlu0 %v3257_v38, %s3517_s13  ;;  %s1788_s13 = sshll.u32 %s3252_s14, 4  ;;  %s2108_s18 = sshll.u32 %s2719_s17, 3  ;;  %s3326_s13 = int_to_ptr.vmem [resolvable:$true] %s1788_s13 }
 0x33e   : > { %s1785_s0 = sadd.s32 %s2715_s16, %s2108_s18  ;;  %s2549_s18 = scalar_lea.vmem %s3328_s11, 512 }
 0x33f   : > { %s3333_s2 = sshll.u32 %s1785_s0, 7  ;;  %s3348_s0 = scalar_lea.sflag [#allocation7], %s1763_s1 }
 0x340   : > { %s3345_s7 = scalar_lea.hbm %s3558_s12, %s3333_s2  ;;  %p2550_p13 = scmp.ne.s32.totalorder %s3328_s11, %s2549_s18 }
 0x341   : > { %p2557_p4 = scmp.lt.s32.totalorder %s2555_s8, %s2549_s18 }
 0x342   : > { %p2551_p0 = pnand %p2550_p13, %p2880_p3 }
 0x343   : > { %p2558_p5 = por %p2557_p4, %p2556_p2 }
 0x344   : > { %p2552_p1 = pneg %p2551_p0 }
 0x346   : > { %p2559_p6 = pnand %p2558_p5, %p2552_p1 }
 0x3a7   : > { %v1228_v40 = vpop.permute.xlu1 %1227  ;;  %v1233_v41 = vpop.permute.xlu0 %1232 }
 0x3a8   : > { %2086 = vst.msk [vmem:[%s3252_s14 + $0x8] sm:$0xff] %vm842_vm1, %v1228_v40  ;;  %2087 = vst.msk [vmem:[%s3252_s14 + $0x10] sm:$0xff] %vm842_vm1, %v1233_v41 }
 0x3ab   : > { %v1238_v42 = vpop.permute.xlu1 %1237  ;;  %v1401_v43 = vpop.permute.xlu0 %1400 }
 0x3ac   : > { %2088 = vst.msk [vmem:[%s3252_s14 + $0x18] sm:$0xff] %vm842_vm1, %v1238_v42  ;;  %2091 = vst.msk [vmem:[%s3264_s23 + $0x8] sm:$0xff] %vm842_vm1, %v1401_v43 }
 0x3af   : > { %v1406_v44 = vpop.permute.xlu1 %1405  ;;  %v1411_v45 = vpop.permute.xlu0 %1410 }
 0x3b0   : > { %2092 = vst.msk [vmem:[%s3264_s23 + $0x10] sm:$0xff] %vm842_vm1, %v1406_v44  ;;  %2093 = vst.msk [vmem:[%s3264_s23 + $0x18] sm:$0xff] %vm842_vm1, %v1411_v45 }
 0x3fb   : > { %v1482_v46 = vpop.f32.mrf.mxu1 }
 0x3fc   : > { %v1486_v47 = vmul.f32 0.03125, %v1482_v46 }
 0x3fd   : > { %v2356_v48 = vpop.f32.mrf.mxu1 }
 0x3fe   : > { %2360 = vmatmul.mubr.msk.f32.vlgmr.msra.gmra.mxu0 %vm1137_vm3, %v1486_v47 }
 0x3ff   : > { %2363 = vmatpush3.msra.mxu0 %v2992_v9  ;;  %2394 = vmatprep.mubr.msk.f32.mxu0 %vm2737_vm0, %v2736_v0 }
 0x400   : > { %2364 = vmatprep.subr.mxu0 %v2736_v0 }
 0x401   : > { %2365 = vmatpush3.msra.mxu0 %v3000_v11 }
 0x402   : > { %2366 = vmatprep.subr.mxu0 %v2736_v0 }
 0x403   : > { %2367 = vmatpush3.msra.mxu0 %v3010_v12 }
 0x404   : > { %2368 = vmatprep.subr.mxu0 %v2736_v0 }
 0x405   : > { %2369 = vmatpush3.msra.mxu0 %v3019_v13 }
 0x406   : > { %2370 = vmatprep.subr.mxu0 %v2736_v0 }
 0x407   : > { %2371 = vmatpush3.msra.mxu0 %v3028_v14 }
 0x408   : > { %2372 = vmatprep.subr.mxu0 %v2736_v0 }
 0x409   : > { %2373 = vmatpush3.msra.mxu0 %v3037_v15 }
 0x40a   : > { %2374 = vmatprep.subr.mxu0 %v2736_v0 }
 0x40b   : > { %2375 = vmatpush3.msra.mxu0 %v3046_v16 }
 0x40c   : > { %2376 = vmatprep.subr.mxu0 %v2736_v0 }
 0x40d   : > { %2377 = vmatpush3.msra.mxu0 %v3055_v17 }
 0x40e   : > { %2378 = vmatprep.subr.mxu0 %v2736_v0 }
 0x40f   : > { %2379 = vmatpush3.msra.mxu0 %v3064_v18 }
 0x410   : > { %2380 = vmatprep.subr.mxu0 %v2736_v0 }
 0x411   : > { %2381 = vmatpush3.msra.mxu0 %v3073_v19 }
 0x412   : > { %2382 = vmatprep.subr.mxu0 %v2736_v0 }
 0x413   : > { %2383 = vmatpush3.msra.mxu0 %v3082_v20 }
 0x414   : > { %2384 = vmatprep.subr.mxu0 %v2736_v0 }
 0x415   : > { %2385 = vmatpush3.msra.mxu0 %v3091_v21 }
 0x416   : > { %2386 = vmatprep.subr.mxu0 %v2736_v0 }
 0x417   : > { %2387 = vmatpush3.msra.mxu0 %v3100_v22 }
 0x418   : > { %2388 = vmatprep.subr.mxu0 %v2736_v0 }
 0x419   : > { %2389 = vmatpush3.msra.mxu0 %v3120_v23 }
 0x41a   : > { %2390 = vmatprep.subr.mxu0 %v2736_v0 }
 0x41b   : > { %2391 = vmatpush3.msra.mxu0 %v3128_v24  ;;  %v2098_v24 = vld [vmem:[%s3556_s9] ss:$0 sm:$0xff] }
 0x41c   : > { %2392 = vmatprep.subr.mxu0 %v2736_v0 }
 0x41d   : > { %2393 = vmatpush3.msra.mxu0 %v3137_v25 }
 0x4be   : > { %v1556_v9 = vpop.f32.mrf.mxu0 }
 0x4bf   : > { %v1560_v11 = vsub.f32 %v1415_v39, %v1556_v9 }
 0x4c0   : > { %v2361_v12 = vpop.f32.mrf.mxu0 }
 0x4c1   : > { %v1561_v13 = vmul.f32 %v1560_v11, %v1560_v11 }
 0x4c3   : > { %2395 = vmatmul.mubr.f32.vlgmr.msra.gmra.mxu0 %v1561_v13 }
 0x583   : > { %v1628_v14 = vpop.f32.mrf.mxu0 }
 0x584   : > { %v1632_v15 = vmul.f32 0.032258064, %v1628_v14 }
 0x585   : > { %v2396_v16 = vpop.f32.mrf.mxu0 }
 0x586   : > { %2519 = vrsqrt.f32 %v1632_v15  ;;  %vm1635_vm4 = vcmp.eq.f32.partialorder %v1632_v15, inf  ;;  %v1638_v0 = vand.u32 2147483648, %v1632_v15  ;;  %vm1637_vm5 = vcmp.eq.f32.partialorder %v1632_v15, 0.0 }
 0x593   : > { %v2520_v17 = vpop.eup %2519 }
 0x594   : > { %v1634_v18 = vmul.f32 %v2520_v17, %v1632_v15 }
 0x596   : > { %v1636_v19 = vsel %vm1635_vm4, %v1632_v15, %v1634_v18 }
 0x597   : > { %v1639_v20 = vsel %vm1637_vm5, %v1638_v0, %v1636_v19 }
 0x598   : > { %v1640_v21 = vadd.f32 1e-08, %v1639_v20 }
 0x59a   : > { %2521 = vrcp.f32 %v1640_v21 }
 0x5a7   : > { %v2522_v22 = vpop.eup %2521 }
 0x5a8   : > { %2400 = vmatmul.mubr.msk.f32.vlgmr.msra.gmra.mxu1 %vm1137_vm3, %v2522_v22 }
 0x668   : > { %v1712_v23 = vpop.f32.mrf.mxu1 }
 0x669   : > { %v1716_v25 = vmul.f32 %v1712_v23, %v1560_v11 }
 0x66a   : > { %v2401_v50 = vpop.f32.mrf.mxu1 }
 0x66b   : > { %2562 = shalt.err (!%p2559_p6)
}
 0x66c   : > { %s2563_s1 = scalar_lea.hbm %s3345_s7, 512  ;;  %s2567_s14 = scalar_lea.hbm %s3558_s12, 2048 }
 0x66d   : > { %p2564_p7 = scmp.ne.s32.totalorder %s3345_s7, %s2563_s1  ;;  %p2568_p10 = scmp.lt.s32.totalorder %s3345_s7, %s3558_s12 }
 0x66e   : > { %p2569_p12 = scmp.lt.s32.totalorder %s2567_s14, %s2563_s1 }
 0x66f   : > { %p2565_p9 = pnand %p2564_p7, %p2880_p3 }
 0x670   : > { %p2570_p13 = por %p2569_p12, %p2568_p10 }
 0x671   : > { %p2566_p11 = pneg %p2565_p9 }
 0x673   : > { %p2571_p0 = pnand %p2570_p13, %p2566_p11 }
 0x675   : > { %2574 = shalt.err (!%p2571_p0)
}
 0x676   : > { %s3520_s8 = smov 128   ;;  %s2745_s18 = smov 256   ;;  %v1724_v51 = vmul.f32 %v2098_v24, %v1716_v25 }
 0x677   : > { %s2746_s4 = smov 8   ;;  %s3559_s6 = sld [smem:[#allocation30_spill]] }
 0x678   : > { %2407 = dma.vmem_to_hbm [thread:$0]  (%p2880_p3), %s3328_s11, 512, %s3345_s7, %s3348_s0, %s3520_s8, %s2745_s18, %s2746_s4  }
 0x679   : > { %s1759_s23 = scalar_lea.sflag [#allocation4], %s3178_s26  ;;  %s2575_s3 = scalar_lea.vmem %s3326_s13, 512 }
 0x67a   : > { %p2576_p1 = scmp.ne.s32.totalorder %s3326_s13, %s2575_s3  ;;  %s2747_s21 = smov [#allocation5]  }
 0x67b   : > { %s2579_s9 = sshll.u32 %s2747_s21, 4  ;;  %s2580_s9 = int_to_ptr.vmem [resolvable:$false] %s2579_s9 }
 0x67c   : > { %p2577_p2 = pnand %p2576_p1, %p2880_p3  ;;  %s2581_s10 = scalar_lea.vmem %s2580_s9, 1024 }
 0x67d   : > { %s3378_s14 = scalar_lea.hbm %s3559_s6, %s3333_s2  ;;  %p2582_p5 = scmp.lt.s32.totalorder %s3326_s13, %s2580_s9 }
 0x67e   : > { %p2578_p4 = pneg %p2577_p2  ;;  %p2583_p6 = scmp.lt.s32.totalorder %s2581_s10, %s2575_s3 }
 0x680   : > { %p2584_p7 = por %p2583_p6, %p2582_p5 }
 0x682   : > { %p2585_p9 = pnand %p2584_p7, %p2578_p4 }
 0x684   : > { %2588 = shalt.err (!%p2585_p9)
}
 0x685   : > { %s2589_s7 = scalar_lea.hbm %s3378_s14, 512  ;;  %s2593_s21 = scalar_lea.hbm %s3559_s6, 2048 }
 0x686   : > { %p2590_p11 = scmp.ne.s32.totalorder %s3378_s14, %s2589_s7  ;;  %p2594_p13 = scmp.lt.s32.totalorder %s3378_s14, %s3559_s6 }
 0x687   : > { %p2595_p0 = scmp.lt.s32.totalorder %s2593_s21, %s2589_s7 }
 0x688   : > { %p2591_p10 = pnand %p2590_p11, %p2880_p3 }
 0x689   : > { %p2596_p1 = por %p2595_p0, %p2594_p13 }
 0x68a   : > { %p2592_p12 = pneg %p2591_p10 }
 0x68c   : > { %p2597_p2 = pnand %p2596_p1, %p2592_p12 }
 0x68e   : > { %2600 = shalt.err (!%p2597_p2)
}
 0x68f   : > { %s3560_s9 = smov 128   ;;  %v1732_v52 = vadd.f32 %v2099_v49, %v1724_v51  ;;  %s3561_s10 = sshll.u32 %s2719_s17, 1 }
 0x690   : > { %2406 = dma.vmem_to_hbm [thread:$0]  (%p2880_p3), %s3326_s13, 512, %s3378_s14, %s1759_s23, %s3560_s9, %s2745_s18, %s2746_s4  }
 0x691   : > { %s1836_s8 = sadd.s32 %s2715_s16, %s3561_s10  ;;  %s1840_s3 = sshll.u32 %s3181_s29, 4  ;;  %v1733_v53 = vadd.f32 %v1732_v52, %v3257_v38  ;;  %s1841_s3 = int_to_ptr.vmem [resolvable:$true] %s1840_s3 }
 0x692   : > { %s2115_s7 = sshll.u32 %s1836_s8, 7  ;;  %s3562_s21 = sld [smem:[#allocation33_spill]] }
 0x693   : > { %s1774_s6 = scalar_lea.sflag [#allocation10], %s3178_s26  ;;  %s2601_s12 = scalar_lea.vmem %s1841_s3, 128 }
 0x694   : > { %p2602_p4 = scmp.ne.s32.totalorder %s1841_s3, %s2601_s12  ;;  %s2748_s24 = smov [#allocation9]  }
 0x695   : > { %s2605_s13 = sshll.u32 %s2748_s24, 4  ;;  %s2606_s13 = int_to_ptr.vmem [resolvable:$false] %s2605_s13 }
 0x696   : > { %p2603_p5 = pnand %p2602_p4, %p2880_p3  ;;  %s2607_s17 = scalar_lea.vmem %s2606_s13, 256 }
 0x697   : > { %p2608_p7 = scmp.lt.s32.totalorder %s1841_s3, %s2606_s13  ;;  %p2609_p9 = scmp.lt.s32.totalorder %s2607_s17, %s2601_s12 }
 0x698   : > { %s1838_s5 = scalar_lea.hbm %s3562_s21, %s2115_s7  ;;  %p2604_p6 = pneg %p2603_p5 }
 0x699   : > { %p2610_p11 = por %p2609_p9, %p2608_p7 }
 0x69b   : > { %p2611_p10 = pnand %p2610_p11, %p2604_p6 }
 0x69d   : > { %2614 = shalt.err (!%p2611_p10)
}
 0x69e   : > { %s2615_s16 = scalar_lea.hbm %s1838_s5, 128  ;;  %s2619_s14 = scalar_lea.hbm %s3562_s21, 512 }
 0x69f   : > { %p2616_p12 = scmp.ne.s32.totalorder %s1838_s5, %s2615_s16  ;;  %p2620_p1 = scmp.lt.s32.totalorder %s1838_s5, %s3562_s21 }
 0x6a0   : > { %p2621_p2 = scmp.lt.s32.totalorder %s2619_s14, %s2615_s16 }
 0x6a1   : > { %p2617_p13 = pnand %p2616_p12, %p2880_p3 }
 0x6a2   : > { %p2622_p4 = por %p2621_p2, %p2620_p1 }
 0x6a3   : > { %p2618_p0 = pneg %p2617_p13 }
 0x6a5   : > { %p2623_p5 = pnand %p2622_p4, %p2618_p0 }
 0x6a7   : > { %2626 = shalt.err (!%p2623_p5)
}
 0x6a8   : > { %2409 = dma.vmem_to_hbm [thread:$0]  (%p2880_p3), %s1841_s3, 128, %s1838_s5, %s1774_s6  }
 0x6a9   : > { %s3563_s12 = smov 64   ;;  %s3564_s24 = smov 96  }
 0x6aa   : > { %1741 = vrot.lane.b32.xlu1 %v1733_v53, %s3563_s12  ;;  %1736 = vrot.lane.b32.xlu0 %v1733_v53, %s3564_s24  ;;  %s563_s8 = scalar_lea.vmem [#allocation8], %s3242_s25  ;;  %s3565_s7 = smov 32  }
 0x6ab   : > { %1734 = vst.msk [vmem:[%s563_s8] sm:$0xff] %vm842_vm1, %v1733_v53  ;;  %s1822_s11 = sshll.u32 %s563_s8, 4  ;;  %s3566_s1 = sld [smem:[#allocation32_spill]]  ;;  %s3432_s11 = int_to_ptr.vmem [resolvable:$true] %s1822_s11 }
 0x6ac   : > { %s2627_s5 = scalar_lea.vmem %s3432_s11, 512  ;;  %s2749_s13 = smov [#allocation8]  }
 0x6ad   : > { %p2628_p6 = scmp.ne.s32.totalorder %s3432_s11, %s2627_s5  ;;  %s2631_s17 = sshll.u32 %s2749_s13, 4  ;;  %s2632_s17 = int_to_ptr.vmem [resolvable:$false] %s2631_s17 }
 0x6ae   : > { %1746 = vrot.lane.b32.xlu0 %v1733_v53, %s3565_s7  ;;  %s2633_s16 = scalar_lea.vmem %s2632_s17, 1024  ;;  %p2634_p11 = scmp.lt.s32.totalorder %s3432_s11, %s2632_s17 }
 0x6af   : > { %p2629_p7 = pnand %p2628_p6, %p2880_p3  ;;  %p2635_p10 = scmp.lt.s32.totalorder %s2633_s16, %s2627_s5 }
 0x6b1   : > { %s3438_s25 = scalar_lea.hbm %s3566_s1, %s3333_s2  ;;  %p2630_p9 = pneg %p2629_p7 }
 0x6b2   : > { %p2636_p12 = por %p2635_p10, %p2634_p11 }
 0x6b4   : > { %p2637_p13 = pnand %p2636_p12, %p2630_p9 }
 0x71c   : > { %v1742_v54 = vpop.permute.xlu1 %1741  ;;  %v1737_v55 = vpop.permute.xlu0 %1736 }
 0x71d   : > { %2101 = vst.msk [vmem:[%s563_s8 + $0x10] sm:$0xff] %vm842_vm1, %v1742_v54  ;;  %2100 = vst.msk [vmem:[%s563_s8 + $0x8] sm:$0xff] %vm842_vm1, %v1737_v55 }
 0x720   : > { %v1747_v56 = vpop.permute.xlu0 %1746 }
 0x721   : > { %2102 = vst.msk [vmem:[%s563_s8 + $0x18] sm:$0xff] %vm842_vm1, %v1747_v56 }
 0x722   : > { %2640 = shalt.err (!%p2637_p13)
}
 0x723   : > { %s2641_s2 = scalar_lea.hbm %s3438_s25, 512  ;;  %s2645_s14 = scalar_lea.hbm %s3566_s1, 2048 }
 0x724   : > { %p2642_p0 = scmp.ne.s32.totalorder %s3438_s25, %s2641_s2  ;;  %p2646_p4 = scmp.lt.s32.totalorder %s3438_s25, %s3566_s1 }
 0x725   : > { %p2647_p5 = scmp.lt.s32.totalorder %s2645_s14, %s2641_s2 }
 0x726   : > { %p2643_p1 = pnand %p2642_p0, %p2880_p3 }
 0x727   : > { %p2648_p6 = por %p2647_p5, %p2646_p4 }
 0x728   : > { %p2644_p2 = pneg %p2643_p1 }
 0x72a   : > { %p2649_p7 = pnand %p2648_p6, %p2644_p2 }
 0x72c   : > { %2652 = shalt.err (!%p2649_p7)
}
 0x72d   : > { %2408 = dma.vmem_to_hbm [thread:$0]  (%p2880_p3), %s3432_s11, 512, %s3438_s25, %s3348_s0, %s3560_s9, %s2745_s18, %s2746_s4  }
 0x72e PF: > { %s3567_s12 = sld [smem:[#allocation15_spill]]  ;;  %p2433_p9 = scmp.ge.s32.totalorder %s2731_s20, 2 }
 0x730   : > { %p2419_p11 = pnand %p2433_p9, %p2891_p8 }
 0x732   : > { %p2420_p10 = pneg %p2419_p11 }
 0x734   : > { %s1852_s24 = sand.u32 1, %s3567_s12  }
 0x735   : > { %s1853_s8 = scalar_lea.sflag [#allocation4], %s1852_s24 }
 0x736   : > { %2690 = dma.done.wait (%p2420_p10), %s1853_s8, 512  }
 0x737   : > { %2692 = vsyncadd (%p2420_p10), %s1853_s8, 4294966784  ;;  %s3568_s27 = sadd.s32 4294967294, %s2731_s20  }
 0x738   : > { %s1861_s7 = sand.u32 1, %s3568_s27  }
 0x739   : > { %s1862_s6 = scalar_lea.sflag [#allocation7], %s1861_s7 }
 0x73a   : > { %2694 = dma.done.wait (%p2420_p10), %s1862_s6, 1024  }
 0x73b   : > { %2696 = vsyncadd (%p2420_p10), %s1862_s6, 4294966272  ;;  %s1880_s3 = scalar_lea.sflag [#allocation10], %s1852_s24 }
 0x73c   : > { %2698 = dma.done.wait (%p2420_p10), %s1880_s3, 128  }
 0x73d   : > { %2700 = vsyncadd (%p2420_p10), %s1880_s3, 4294967168  ;;  %s35_s20 = sadd.s32 1, %s2731_s20   ;;  %s3569_s16 = sld [smem:[#allocation16_spill]] }
 0x73e   : > { %p32_p3 = scmp.ge.s32.totalorder %s35_s20, 6   ;;  %s3570_s18 = sld [smem:[#allocation17_spill]] }
 0x73f   : > { %s3571_s28 = sld [smem:[#allocation18_spill]]  ;;  %s3572_s29 = smov %s2707_s30 }
 0x740   : > { %s3573_s30 = smov %s2711_s15  ;;  %s3574_s15 = smov %s2906_s22 }
 0x741   : > { %s3575_s17 = smov %s2727_s19  ;;  %34 = sbr.rel (!%p32_p3) target bundleno = 26 (0x1a), region = 171 }
 0x745   : > { %s3576_s19 = smov %s3571_s28 }
 0x746   :  { %1885 = vsyncpa [#allocation3], 1 }
 0x747   :  { %1887 = vsyncpa [#allocation3 + $0x1], 1 }
 0x748   :  { %1888 = vsyncpa [#allocation4], 1 }
 0x749   :  { %1890 = vsyncpa [#allocation4 + $0x1], 1 }
 0x74a   :  { %1891 = vsyncpa [#allocation7], 1 }
 0x74b   :  { %1893 = vsyncpa [#allocation7 + $0x1], 1 }
 0x74c   :  { %1894 = vsyncpa [#allocation10], 1 }
 0x74d   :  { %1896 = vsyncpa [#allocation10 + $0x1], 1 }

</bundles_post_ra>
